<compile_context>
chip_gen: v6e
topology: v6e:2x2x1
jax: 0.10.0
libtpu: 0.0.40
codegen_flags: <defaults>
</compile_context>

<pallas_src>
import functools

import jax
import jax.numpy as jnp
from jax.experimental import pallas as pl
from jax.experimental.pallas import tpu as pltpu

C_IN = 3
HIDDEN = 3          # hidden_dim in the PyTorch module
K = 3               # conv kernel size
EPS = 1e-5          # BatchNorm2d default eps
LANE_PAD = 128      # zero pad (lanes) on each side of the flattened H*W axis


def bug_encoder_kernel(x_ref, w_ref, b_ref, g_ref, beta_ref, o_ref, xp_ref,
                       *, H, W):
    """Fused conv3x3(pad=1) + BatchNorm2d(train stats) + ReLU.

    x_ref   : (N, C_in, H*W)    VMEM, lane-dense NCHW input slab
    w_ref   : (C_out*C_in*K*K,) SMEM, conv weights flattened in OIHW order
    b_ref   : (C_out,)          SMEM, conv bias
    g_ref   : (C_out,)          SMEM, BN gamma
    beta_ref: (C_out,)          SMEM, BN beta
    o_ref   : (N, C_out, H*W)   VMEM, lane-dense NCHW output slab
    xp_ref  : (N, C_in, LANE_PAD + H*W + LANE_PAD) VMEM scratch (padded copy)
    """
    N, Cin, HW = x_ref.shape
    Cout = o_ref.shape[1]

    # Zero pad bands absorb every row-overflow read of the 3x3 taps
    # (|shift| <= W+1 <= LANE_PAD).  Center copy is lane-aligned (offset 128).
    zero_band = jnp.zeros((N, Cin, LANE_PAD), jnp.float32)
    xp_ref[:, :, pl.ds(0, LANE_PAD)] = zero_band
    xp_ref[:, :, pl.ds(LANE_PAD + HW, LANE_PAD)] = zero_band
    xp_ref[:, :, pl.ds(LANE_PAD, HW)] = x_ref[...].astype(xp_ref.dtype)

    # Column-validity masks (per-lane, depend only on w = lane % W).
    col = jax.lax.broadcasted_iota(jnp.int32, (1, HW), 1) % W
    mask_left = col >= 1           # reading the (w-1) neighbour is valid
    mask_right = col <= W - 2      # reading the (w+1) neighbour is valid

    # Conv accumulators, one per output channel, initialized with the bias.
    accs = [jnp.full((N, HW), b_ref[co], dtype=jnp.float32)
            for co in range(Cout)]

    # 3x3 conv: each shifted window is loaded/masked once and reused by all
    # output channels; every tap is a scalar(SMEM) x vector MAC (VPU work).
    for kh in range(K):
        for kw in range(K):
            dh, dw = kh - 1, kw - 1
            base = LANE_PAD + dh * W + dw            # static lane offset
            if dw == -1:
                m = mask_left
            elif dw == 1:
                m = mask_right
            else:
                m = None
            for ci in range(Cin):
                v = xp_ref[:, ci, pl.ds(base, HW)]   # (N, HW) f32
                if m is not None:
                    v = jnp.where(m, v, 0.0)
                for co in range(Cout):
                    wk = w_ref[((co * Cin + ci) * K + kh) * K + kw]
                    accs[co] = accs[co] + v * wk

    # BatchNorm2d (training-mode batch statistics over N,H,W), single pass:
    # sum / sum-of-squares -> mean, biased var -> one fused affine + ReLU.
    inv_count = 1.0 / float(N * HW)
    for co in range(Cout):
        acc = accs[co]
        s1 = jnp.sum(acc)
        s2 = jnp.sum(acc * acc)
        mean = s1 * inv_count
        var = s2 * inv_count - mean * mean
        scale = g_ref[co] * jax.lax.rsqrt(var + EPS)
        shift = beta_ref[co] - mean * scale
        y = jnp.maximum(acc * scale + shift, 0.0)
        o_ref[:, co, :] = y.astype(o_ref.dtype)


@jax.jit
def bug_encoder_forward(x_nchw, w_oihw, bias, gamma, beta):
    """NCHW in/out (PyTorch convention). Only pure reshapes outside the kernel."""
    N, C, H, W = x_nchw.shape
    assert C == C_IN
    assert W + 1 <= LANE_PAD
    HW = H * W

    x_slab = x_nchw.reshape(N, C, HW)      # pure reshape, no data movement
    w_flat = w_oihw.reshape(-1)            # OIHW order, read as SMEM scalars

    kernel = functools.partial(bug_encoder_kernel, H=H, W=W)

    out_slab = pl.pallas_call(
        kernel,
        out_shape=jax.ShapeDtypeStruct((N, HIDDEN, HW), x_nchw.dtype),
        in_specs=[
            pl.BlockSpec(memory_space=pltpu.MemorySpace.VMEM),   # x slab
            pl.BlockSpec(memory_space=pltpu.MemorySpace.SMEM),   # conv weights
            pl.BlockSpec(memory_space=pltpu.MemorySpace.SMEM),   # conv bias
            pl.BlockSpec(memory_space=pltpu.MemorySpace.SMEM),   # BN gamma
            pl.BlockSpec(memory_space=pltpu.MemorySpace.SMEM),   # BN beta
        ],
        out_specs=pl.BlockSpec(memory_space=pltpu.MemorySpace.VMEM),
        scratch_shapes=[
            pltpu.VMEM((N, C_IN, LANE_PAD + HW + LANE_PAD), jnp.float32),
        ],
    )(x_slab, w_flat, bias, gamma, beta)

    return out_slab.reshape(N, HIDDEN, H, W)   # pure reshape back to NCHW


def reference_forward(x_nchw, w_oihw, bias, gamma, beta):
    """Pure-JAX reference mirroring the PyTorch forward (train-mode BN)."""
    y = jax.lax.conv_general_dilated(
        x_nchw, w_oihw, window_strides=(1, 1), padding=((1, 1), (1, 1)),
        dimension_numbers=("NCHW", "OIHW", "NCHW"))
    y = y + bias[None, :, None, None]
    mean = jnp.mean(y, axis=(0, 2, 3), keepdims=True)
    var = jnp.mean((y - mean) ** 2, axis=(0, 2, 3), keepdims=True)
    y = (y - mean) * jax.lax.rsqrt(var + EPS)
    y = y * gamma[None, :, None, None] + beta[None, :, None, None]
    return jnp.maximum(y, 0.0)


def init_params(key):
    """Deterministic parameter init matching Conv2d/BatchNorm2d shapes."""
    kw_key, kb_key = jax.random.split(key)
    fan_in = C_IN * K * K
    bound = 1.0 / jnp.sqrt(fan_in)
    w = jax.random.uniform(kw_key, (HIDDEN, C_IN, K, K),
                           minval=-bound, maxval=bound, dtype=jnp.float32)
    b = jax.random.uniform(kb_key, (HIDDEN,),
                           minval=-bound, maxval=bound, dtype=jnp.float32)
    gamma = jnp.ones((HIDDEN,), jnp.float32)   # BN weight
    beta = jnp.zeros((HIDDEN,), jnp.float32)   # BN bias
    return w, b, gamma, beta


if __name__ == "__main__":
    key = jax.random.PRNGKey(0)
    x_key, p_key = jax.random.split(key)

    # Small NCHW input consistent with the module: batch=2, C_in=3, 16x16.
    x = jax.random.normal(x_key, (2, 3, 16, 16), dtype=jnp.float32)
    w, b, gamma, beta = init_params(p_key)

    out = jax.block_until_ready(bug_encoder_forward(x, w, b, gamma, beta))
    ref = jax.block_until_ready(reference_forward(x, w, b, gamma, beta))

    assert out.shape == ref.shape == (2, HIDDEN, 16, 16)
    assert jnp.allclose(out, ref, rtol=1e-4, atol=1e-4), "mismatch vs reference"

    print("KERNEL_OK")
</pallas_src>

<mosaic_0001>
module attributes {stable_mosaic.version = 11 : i64} {
  func.func @bug_encoder_kernel(%arg0: memref<2x3x256xf32, #tpu.memory_space<vmem>>, %arg1: memref<81xf32, #tpu.memory_space<smem>>, %arg2: memref<3xf32, #tpu.memory_space<smem>>, %arg3: memref<3xf32, #tpu.memory_space<smem>>, %arg4: memref<3xf32, #tpu.memory_space<smem>>, %arg5: memref<2x3x256xf32, #tpu.memory_space<vmem>>, %arg6: memref<2x3x512xf32, #tpu.memory_space<vmem>>) attributes {dimension_semantics = [], scalar_prefetch = 0 : i64, scratch_operands = 1 : i64, tpu.core_type = #tpu.core_type<tc>} {
    %cst = arith.constant 0.000000e+00 : f32
    %0 = vector.broadcast %cst : f32 to vector<2x3x128xf32>
    %c0 = arith.constant 0 : index
    %c0_0 = arith.constant 0 : index
    %c0_1 = arith.constant 0 : index
    %1 = vector.load %arg6[%c0, %c0_0, %c0_1] : memref<2x3x512xf32, #tpu.memory_space<vmem>>, vector<2x3x128xf32>
    tpu.vector_store %arg6[%c0, %c0_0, %c0_1], %0 {strides = array<i32>} : memref<2x3x512xf32, #tpu.memory_space<vmem>>, vector<2x3x128xf32>,
    %c0_2 = arith.constant 0 : index
    %c0_3 = arith.constant 0 : index
    %c384 = arith.constant 384 : index
    %2 = vector.load %arg6[%c0_2, %c0_3, %c384] : memref<2x3x512xf32, #tpu.memory_space<vmem>>, vector<2x3x128xf32>
    tpu.vector_store %arg6[%c0_2, %c0_3, %c384], %0 {strides = array<i32>} : memref<2x3x512xf32, #tpu.memory_space<vmem>>, vector<2x3x128xf32>,
    %c0_4 = arith.constant 0 : index
    %c0_5 = arith.constant 0 : index
    %c0_6 = arith.constant 0 : index
    %3 = vector.load %arg0[%c0_4, %c0_5, %c0_6] : memref<2x3x256xf32, #tpu.memory_space<vmem>>, vector<2x3x256xf32>
    %c0_7 = arith.constant 0 : index
    %c0_8 = arith.constant 0 : index
    %c128 = arith.constant 128 : index
    %4 = vector.load %arg6[%c0_7, %c0_8, %c128] : memref<2x3x512xf32, #tpu.memory_space<vmem>>, vector<2x3x256xf32>
    tpu.vector_store %arg6[%c0_7, %c0_8, %c128], %3 {strides = array<i32>} : memref<2x3x512xf32, #tpu.memory_space<vmem>>, vector<2x3x256xf32>,
    %5 = tpu.iota {dimensions = array<i32: 1>} : vector<1x256xi32>
    %c16_i32 = arith.constant 16 : i32
    %c0_i32 = arith.constant 0 : i32
    %6 = arith.cmpi eq, %c16_i32, %c0_i32 : i32
    %c1_i32 = arith.constant 1 : i32
    %7 = arith.select %6, %c1_i32, %c16_i32 : i32
    %8 = vector.broadcast %7 : i32 to vector<1x256xi32>
    %9 = arith.remsi %5, %8 : vector<1x256xi32>
    %c0_i32_9 = arith.constant 0 : i32
    %10 = vector.broadcast %c0_i32_9 : i32 to vector<1x256xi32>
    %11 = arith.cmpi ne, %9, %10 : vector<1x256xi32>
    %c0_i32_10 = arith.constant 0 : i32
    %12 = vector.broadcast %c0_i32_10 : i32 to vector<1x256xi32>
    %13 = arith.cmpi slt, %9, %12 : vector<1x256xi32>
    %c0_i32_11 = arith.constant 0 : i32
    %14 = arith.cmpi slt, %7, %c0_i32_11 : i32
    %15 = vector.broadcast %14 : i1 to vector<1x256xi1>
    %16 = vector.broadcast %15 : vector<1x256xi1> to vector<1x256xi1>
    %17 = arith.xori %13, %16 : vector<1x256xi1>
    %18 = arith.andi %17, %11 : vector<1x256xi1>
    %19 = vector.broadcast %7 : i32 to vector<1x256xi32>
    %20 = arith.addi %9, %19 : vector<1x256xi32>
    %21 = arith.select %18, %20, %9 : vector<1x256xi1>, vector<1x256xi32>
    %c1_i32_12 = arith.constant 1 : i32
    %22 = vector.broadcast %c1_i32_12 : i32 to vector<1x256xi32>
    %23 = arith.cmpi sge, %21, %22 : vector<1x256xi32>
    %c14_i32 = arith.constant 14 : i32
    %24 = vector.broadcast %c14_i32 : i32 to vector<1x256xi32>
    %25 = arith.cmpi sle, %21, %24 : vector<1x256xi32>
    %c0_13 = arith.constant 0 : index
    %26 = memref.load %arg2[%c0_13] : memref<3xf32, #tpu.memory_space<smem>>
    %27 = vector.broadcast %26 : f32 to vector<2x256xf32>
    %c1 = arith.constant 1 : index
    %28 = memref.load %arg2[%c1] : memref<3xf32, #tpu.memory_space<smem>>
    %29 = vector.broadcast %28 : f32 to vector<2x256xf32>
    %c2 = arith.constant 2 : index
    %30 = memref.load %arg2[%c2] : memref<3xf32, #tpu.memory_space<smem>>
    %31 = vector.broadcast %30 : f32 to vector<2x256xf32>
    %c0_14 = arith.constant 0 : index
    %c0_15 = arith.constant 0 : index
    %c111 = arith.constant 111 : index
    %32 = vector.load %arg6[%c0_14, %c0_15, %c111] : memref<2x3x512xf32, #tpu.memory_space<vmem>>, vector<2x1x256xf32>
    %33 = vector.shape_cast %32 : vector<2x1x256xf32> to vector<2x256xf32>
    %cst_16 = arith.constant 0.000000e+00 : f32
    %34 = vector.shape_cast %23 : vector<1x256xi1> to vector<1x256xi1>
    %35 = vector.broadcast %34 : vector<1x256xi1> to vector<2x256xi1>
    %36 = vector.broadcast %cst_16 : f32 to vector<2x256xf32>
    %37 = arith.select %35, %33, %36 : vector<2x256xi1>, vector<2x256xf32>
    %c0_17 = arith.constant 0 : index
    %38 = memref.load %arg1[%c0_17] : memref<81xf32, #tpu.memory_space<smem>>
    %39 = vector.broadcast %38 : f32 to vector<2x256xf32>
    %40 = arith.mulf %37, %39 : vector<2x256xf32>
    %41 = arith.addf %27, %40 : vector<2x256xf32>
    %c27 = arith.constant 27 : index
    %42 = memref.load %arg1[%c27] : memref<81xf32, #tpu.memory_space<smem>>
    %43 = vector.broadcast %42 : f32 to vector<2x256xf32>
    %44 = arith.mulf %37, %43 : vector<2x256xf32>
    %45 = arith.addf %29, %44 : vector<2x256xf32>
    %c54 = arith.constant 54 : index
    %46 = memref.load %arg1[%c54] : memref<81xf32, #tpu.memory_space<smem>>
    %47 = vector.broadcast %46 : f32 to vector<2x256xf32>
    %48 = arith.mulf %37, %47 : vector<2x256xf32>
    %49 = arith.addf %31, %48 : vector<2x256xf32>
    %c0_18 = arith.constant 0 : index
    %c1_19 = arith.constant 1 : index
    %c111_20 = arith.constant 111 : index
    %50 = vector.load %arg6[%c0_18, %c1_19, %c111_20] : memref<2x3x512xf32, #tpu.memory_space<vmem>>, vector<2x1x256xf32>
    %51 = vector.shape_cast %50 : vector<2x1x256xf32> to vector<2x256xf32>
    %cst_21 = arith.constant 0.000000e+00 : f32
    %52 = vector.shape_cast %23 : vector<1x256xi1> to vector<1x256xi1>
    %53 = vector.broadcast %52 : vector<1x256xi1> to vector<2x256xi1>
    %54 = vector.broadcast %cst_21 : f32 to vector<2x256xf32>
    %55 = arith.select %53, %51, %54 : vector<2x256xi1>, vector<2x256xf32>
    %c9 = arith.constant 9 : index
    %56 = memref.load %arg1[%c9] : memref<81xf32, #tpu.memory_space<smem>>
    %57 = vector.broadcast %56 : f32 to vector<2x256xf32>
    %58 = arith.mulf %55, %57 : vector<2x256xf32>
    %59 = arith.addf %41, %58 : vector<2x256xf32>
    %c36 = arith.constant 36 : index
    %60 = memref.load %arg1[%c36] : memref<81xf32, #tpu.memory_space<smem>>
    %61 = vector.broadcast %60 : f32 to vector<2x256xf32>
    %62 = arith.mulf %55, %61 : vector<2x256xf32>
    %63 = arith.addf %45, %62 : vector<2x256xf32>
    %c63 = arith.constant 63 : index
    %64 = memref.load %arg1[%c63] : memref<81xf32, #tpu.memory_space<smem>>
    %65 = vector.broadcast %64 : f32 to vector<2x256xf32>
    %66 = arith.mulf %55, %65 : vector<2x256xf32>
    %67 = arith.addf %49, %66 : vector<2x256xf32>
    %c0_22 = arith.constant 0 : index
    %c2_23 = arith.constant 2 : index
    %c111_24 = arith.constant 111 : index
    %68 = vector.load %arg6[%c0_22, %c2_23, %c111_24] : memref<2x3x512xf32, #tpu.memory_space<vmem>>, vector<2x1x256xf32>
    %69 = vector.shape_cast %68 : vector<2x1x256xf32> to vector<2x256xf32>
    %cst_25 = arith.constant 0.000000e+00 : f32
    %70 = vector.shape_cast %23 : vector<1x256xi1> to vector<1x256xi1>
    %71 = vector.broadcast %70 : vector<1x256xi1> to vector<2x256xi1>
    %72 = vector.broadcast %cst_25 : f32 to vector<2x256xf32>
    %73 = arith.select %71, %69, %72 : vector<2x256xi1>, vector<2x256xf32>
    %c18 = arith.constant 18 : index
    %74 = memref.load %arg1[%c18] : memref<81xf32, #tpu.memory_space<smem>>
    %75 = vector.broadcast %74 : f32 to vector<2x256xf32>
    %76 = arith.mulf %73, %75 : vector<2x256xf32>
    %77 = arith.addf %59, %76 : vector<2x256xf32>
    %c45 = arith.constant 45 : index
    %78 = memref.load %arg1[%c45] : memref<81xf32, #tpu.memory_space<smem>>
    %79 = vector.broadcast %78 : f32 to vector<2x256xf32>
    %80 = arith.mulf %73, %79 : vector<2x256xf32>
    %81 = arith.addf %63, %80 : vector<2x256xf32>
    %c72 = arith.constant 72 : index
    %82 = memref.load %arg1[%c72] : memref<81xf32, #tpu.memory_space<smem>>
    %83 = vector.broadcast %82 : f32 to vector<2x256xf32>
    %84 = arith.mulf %73, %83 : vector<2x256xf32>
    %85 = arith.addf %67, %84 : vector<2x256xf32>
    %c0_26 = arith.constant 0 : index
    %c0_27 = arith.constant 0 : index
    %c112 = arith.constant 112 : index
    %86 = vector.load %arg6[%c0_26, %c0_27, %c112] : memref<2x3x512xf32, #tpu.memory_space<vmem>>, vector<2x1x256xf32>
    %87 = vector.shape_cast %86 : vector<2x1x256xf32> to vector<2x256xf32>
    %c1_28 = arith.constant 1 : index
    %88 = memref.load %arg1[%c1_28] : memref<81xf32, #tpu.memory_space<smem>>
    %89 = vector.broadcast %88 : f32 to vector<2x256xf32>
    %90 = arith.mulf %87, %89 : vector<2x256xf32>
    %91 = arith.addf %77, %90 : vector<2x256xf32>
    %c28 = arith.constant 28 : index
    %92 = memref.load %arg1[%c28] : memref<81xf32, #tpu.memory_space<smem>>
    %93 = vector.broadcast %92 : f32 to vector<2x256xf32>
    %94 = arith.mulf %87, %93 : vector<2x256xf32>
    %95 = arith.addf %81, %94 : vector<2x256xf32>
    %c55 = arith.constant 55 : index
    %96 = memref.load %arg1[%c55] : memref<81xf32, #tpu.memory_space<smem>>
    %97 = vector.broadcast %96 : f32 to vector<2x256xf32>
    %98 = arith.mulf %87, %97 : vector<2x256xf32>
    %99 = arith.addf %85, %98 : vector<2x256xf32>
    %c0_29 = arith.constant 0 : index
    %c1_30 = arith.constant 1 : index
    %c112_31 = arith.constant 112 : index
    %100 = vector.load %arg6[%c0_29, %c1_30, %c112_31] : memref<2x3x512xf32, #tpu.memory_space<vmem>>, vector<2x1x256xf32>
    %101 = vector.shape_cast %100 : vector<2x1x256xf32> to vector<2x256xf32>
    %c10 = arith.constant 10 : index
    %102 = memref.load %arg1[%c10] : memref<81xf32, #tpu.memory_space<smem>>
    %103 = vector.broadcast %102 : f32 to vector<2x256xf32>
    %104 = arith.mulf %101, %103 : vector<2x256xf32>
    %105 = arith.addf %91, %104 : vector<2x256xf32>
    %c37 = arith.constant 37 : index
    %106 = memref.load %arg1[%c37] : memref<81xf32, #tpu.memory_space<smem>>
    %107 = vector.broadcast %106 : f32 to vector<2x256xf32>
    %108 = arith.mulf %101, %107 : vector<2x256xf32>
    %109 = arith.addf %95, %108 : vector<2x256xf32>
    %c64 = arith.constant 64 : index
    %110 = memref.load %arg1[%c64] : memref<81xf32, #tpu.memory_space<smem>>
    %111 = vector.broadcast %110 : f32 to vector<2x256xf32>
    %112 = arith.mulf %101, %111 : vector<2x256xf32>
    %113 = arith.addf %99, %112 : vector<2x256xf32>
    %c0_32 = arith.constant 0 : index
    %c2_33 = arith.constant 2 : index
    %c112_34 = arith.constant 112 : index
    %114 = vector.load %arg6[%c0_32, %c2_33, %c112_34] : memref<2x3x512xf32, #tpu.memory_space<vmem>>, vector<2x1x256xf32>
    %115 = vector.shape_cast %114 : vector<2x1x256xf32> to vector<2x256xf32>
    %c19 = arith.constant 19 : index
    %116 = memref.load %arg1[%c19] : memref<81xf32, #tpu.memory_space<smem>>
    %117 = vector.broadcast %116 : f32 to vector<2x256xf32>
    %118 = arith.mulf %115, %117 : vector<2x256xf32>
    %119 = arith.addf %105, %118 : vector<2x256xf32>
    %c46 = arith.constant 46 : index
    %120 = memref.load %arg1[%c46] : memref<81xf32, #tpu.memory_space<smem>>
    %121 = vector.broadcast %120 : f32 to vector<2x256xf32>
    %122 = arith.mulf %115, %121 : vector<2x256xf32>
    %123 = arith.addf %109, %122 : vector<2x256xf32>
    %c73 = arith.constant 73 : index
    %124 = memref.load %arg1[%c73] : memref<81xf32, #tpu.memory_space<smem>>
    %125 = vector.broadcast %124 : f32 to vector<2x256xf32>
    %126 = arith.mulf %115, %125 : vector<2x256xf32>
    %127 = arith.addf %113, %126 : vector<2x256xf32>
    %c0_35 = arith.constant 0 : index
    %c0_36 = arith.constant 0 : index
    %c113 = arith.constant 113 : index
    %128 = vector.load %arg6[%c0_35, %c0_36, %c113] : memref<2x3x512xf32, #tpu.memory_space<vmem>>, vector<2x1x256xf32>
    %129 = vector.shape_cast %128 : vector<2x1x256xf32> to vector<2x256xf32>
    %cst_37 = arith.constant 0.000000e+00 : f32
    %130 = vector.shape_cast %25 : vector<1x256xi1> to vector<1x256xi1>
    %131 = vector.broadcast %130 : vector<1x256xi1> to vector<2x256xi1>
    %132 = vector.broadcast %cst_37 : f32 to vector<2x256xf32>
    %133 = arith.select %131, %129, %132 : vector<2x256xi1>, vector<2x256xf32>
    %c2_38 = arith.constant 2 : index
    %134 = memref.load %arg1[%c2_38] : memref<81xf32, #tpu.memory_space<smem>>
    %135 = vector.broadcast %134 : f32 to vector<2x256xf32>
    %136 = arith.mulf %133, %135 : vector<2x256xf32>
    %137 = arith.addf %119, %136 : vector<2x256xf32>
    %c29 = arith.constant 29 : index
    %138 = memref.load %arg1[%c29] : memref<81xf32, #tpu.memory_space<smem>>
    %139 = vector.broadcast %138 : f32 to vector<2x256xf32>
    %140 = arith.mulf %133, %139 : vector<2x256xf32>
    %141 = arith.addf %123, %140 : vector<2x256xf32>
    %c56 = arith.constant 56 : index
    %142 = memref.load %arg1[%c56] : memref<81xf32, #tpu.memory_space<smem>>
    %143 = vector.broadcast %142 : f32 to vector<2x256xf32>
    %144 = arith.mulf %133, %143 : vector<2x256xf32>
    %145 = arith.addf %127, %144 : vector<2x256xf32>
    %c0_39 = arith.constant 0 : index
    %c1_40 = arith.constant 1 : index
    %c113_41 = arith.constant 113 : index
    %146 = vector.load %arg6[%c0_39, %c1_40, %c113_41] : memref<2x3x512xf32, #tpu.memory_space<vmem>>, vector<2x1x256xf32>
    %147 = vector.shape_cast %146 : vector<2x1x256xf32> to vector<2x256xf32>
    %cst_42 = arith.constant 0.000000e+00 : f32
    %148 = vector.shape_cast %25 : vector<1x256xi1> to vector<1x256xi1>
    %149 = vector.broadcast %148 : vector<1x256xi1> to vector<2x256xi1>
    %150 = vector.broadcast %cst_42 : f32 to vector<2x256xf32>
    %151 = arith.select %149, %147, %150 : vector<2x256xi1>, vector<2x256xf32>
    %c11 = arith.constant 11 : index
    %152 = memref.load %arg1[%c11] : memref<81xf32, #tpu.memory_space<smem>>
    %153 = vector.broadcast %152 : f32 to vector<2x256xf32>
    %154 = arith.mulf %151, %153 : vector<2x256xf32>
    %155 = arith.addf %137, %154 : vector<2x256xf32>
    %c38 = arith.constant 38 : index
    %156 = memref.load %arg1[%c38] : memref<81xf32, #tpu.memory_space<smem>>
    %157 = vector.broadcast %156 : f32 to vector<2x256xf32>
    %158 = arith.mulf %151, %157 : vector<2x256xf32>
    %159 = arith.addf %141, %158 : vector<2x256xf32>
    %c65 = arith.constant 65 : index
    %160 = memref.load %arg1[%c65] : memref<81xf32, #tpu.memory_space<smem>>
    %161 = vector.broadcast %160 : f32 to vector<2x256xf32>
    %162 = arith.mulf %151, %161 : vector<2x256xf32>
    %163 = arith.addf %145, %162 : vector<2x256xf32>
    %c0_43 = arith.constant 0 : index
    %c2_44 = arith.constant 2 : index
    %c113_45 = arith.constant 113 : index
    %164 = vector.load %arg6[%c0_43, %c2_44, %c113_45] : memref<2x3x512xf32, #tpu.memory_space<vmem>>, vector<2x1x256xf32>
    %165 = vector.shape_cast %164 : vector<2x1x256xf32> to vector<2x256xf32>
    %cst_46 = arith.constant 0.000000e+00 : f32
    %166 = vector.shape_cast %25 : vector<1x256xi1> to vector<1x256xi1>
    %167 = vector.broadcast %166 : vector<1x256xi1> to vector<2x256xi1>
    %168 = vector.broadcast %cst_46 : f32 to vector<2x256xf32>
    %169 = arith.select %167, %165, %168 : vector<2x256xi1>, vector<2x256xf32>
    %c20 = arith.constant 20 : index
    %170 = memref.load %arg1[%c20] : memref<81xf32, #tpu.memory_space<smem>>
    %171 = vector.broadcast %170 : f32 to vector<2x256xf32>
    %172 = arith.mulf %169, %171 : vector<2x256xf32>
    %173 = arith.addf %155, %172 : vector<2x256xf32>
    %c47 = arith.constant 47 : index
    %174 = memref.load %arg1[%c47] : memref<81xf32, #tpu.memory_space<smem>>
    %175 = vector.broadcast %174 : f32 to vector<2x256xf32>
    %176 = arith.mulf %169, %175 : vector<2x256xf32>
    %177 = arith.addf %159, %176 : vector<2x256xf32>
    %c74 = arith.constant 74 : index
    %178 = memref.load %arg1[%c74] : memref<81xf32, #tpu.memory_space<smem>>
    %179 = vector.broadcast %178 : f32 to vector<2x256xf32>
    %180 = arith.mulf %169, %179 : vector<2x256xf32>
    %181 = arith.addf %163, %180 : vector<2x256xf32>
    %c0_47 = arith.constant 0 : index
    %c0_48 = arith.constant 0 : index
    %c127 = arith.constant 127 : index
    %182 = vector.load %arg6[%c0_47, %c0_48, %c127] : memref<2x3x512xf32, #tpu.memory_space<vmem>>, vector<2x1x256xf32>
    %183 = vector.shape_cast %182 : vector<2x1x256xf32> to vector<2x256xf32>
    %cst_49 = arith.constant 0.000000e+00 : f32
    %184 = vector.shape_cast %23 : vector<1x256xi1> to vector<1x256xi1>
    %185 = vector.broadcast %184 : vector<1x256xi1> to vector<2x256xi1>
    %186 = vector.broadcast %cst_49 : f32 to vector<2x256xf32>
    %187 = arith.select %185, %183, %186 : vector<2x256xi1>, vector<2x256xf32>
    %c3 = arith.constant 3 : index
    %188 = memref.load %arg1[%c3] : memref<81xf32, #tpu.memory_space<smem>>
    %189 = vector.broadcast %188 : f32 to vector<2x256xf32>
    %190 = arith.mulf %187, %189 : vector<2x256xf32>
    %191 = arith.addf %173, %190 : vector<2x256xf32>
    %c30 = arith.constant 30 : index
    %192 = memref.load %arg1[%c30] : memref<81xf32, #tpu.memory_space<smem>>
    %193 = vector.broadcast %192 : f32 to vector<2x256xf32>
    %194 = arith.mulf %187, %193 : vector<2x256xf32>
    %195 = arith.addf %177, %194 : vector<2x256xf32>
    %c57 = arith.constant 57 : index
    %196 = memref.load %arg1[%c57] : memref<81xf32, #tpu.memory_space<smem>>
    %197 = vector.broadcast %196 : f32 to vector<2x256xf32>
    %198 = arith.mulf %187, %197 : vector<2x256xf32>
    %199 = arith.addf %181, %198 : vector<2x256xf32>
    %c0_50 = arith.constant 0 : index
    %c1_51 = arith.constant 1 : index
    %c127_52 = arith.constant 127 : index
    %200 = vector.load %arg6[%c0_50, %c1_51, %c127_52] : memref<2x3x512xf32, #tpu.memory_space<vmem>>, vector<2x1x256xf32>
    %201 = vector.shape_cast %200 : vector<2x1x256xf32> to vector<2x256xf32>
    %cst_53 = arith.constant 0.000000e+00 : f32
    %202 = vector.shape_cast %23 : vector<1x256xi1> to vector<1x256xi1>
    %203 = vector.broadcast %202 : vector<1x256xi1> to vector<2x256xi1>
    %204 = vector.broadcast %cst_53 : f32 to vector<2x256xf32>
    %205 = arith.select %203, %201, %204 : vector<2x256xi1>, vector<2x256xf32>
    %c12 = arith.constant 12 : index
    %206 = memref.load %arg1[%c12] : memref<81xf32, #tpu.memory_space<smem>>
    %207 = vector.broadcast %206 : f32 to vector<2x256xf32>
    %208 = arith.mulf %205, %207 : vector<2x256xf32>
    %209 = arith.addf %191, %208 : vector<2x256xf32>
    %c39 = arith.constant 39 : index
    %210 = memref.load %arg1[%c39] : memref<81xf32, #tpu.memory_space<smem>>
    %211 = vector.broadcast %210 : f32 to vector<2x256xf32>
    %212 = arith.mulf %205, %211 : vector<2x256xf32>
    %213 = arith.addf %195, %212 : vector<2x256xf32>
    %c66 = arith.constant 66 : index
    %214 = memref.load %arg1[%c66] : memref<81xf32, #tpu.memory_space<smem>>
    %215 = vector.broadcast %214 : f32 to vector<2x256xf32>
    %216 = arith.mulf %205, %215 : vector<2x256xf32>
    %217 = arith.addf %199, %216 : vector<2x256xf32>
    %c0_54 = arith.constant 0 : index
    %c2_55 = arith.constant 2 : index
    %c127_56 = arith.constant 127 : index
    %218 = vector.load %arg6[%c0_54, %c2_55, %c127_56] : memref<2x3x512xf32, #tpu.memory_space<vmem>>, vector<2x1x256xf32>
    %219 = vector.shape_cast %218 : vector<2x1x256xf32> to vector<2x256xf32>
    %cst_57 = arith.constant 0.000000e+00 : f32
    %220 = vector.shape_cast %23 : vector<1x256xi1> to vector<1x256xi1>
    %221 = vector.broadcast %220 : vector<1x256xi1> to vector<2x256xi1>
    %222 = vector.broadcast %cst_57 : f32 to vector<2x256xf32>
    %223 = arith.select %221, %219, %222 : vector<2x256xi1>, vector<2x256xf32>
    %c21 = arith.constant 21 : index
    %224 = memref.load %arg1[%c21] : memref<81xf32, #tpu.memory_space<smem>>
    %225 = vector.broadcast %224 : f32 to vector<2x256xf32>
    %226 = arith.mulf %223, %225 : vector<2x256xf32>
    %227 = arith.addf %209, %226 : vector<2x256xf32>
    %c48 = arith.constant 48 : index
    %228 = memref.load %arg1[%c48] : memref<81xf32, #tpu.memory_space<smem>>
    %229 = vector.broadcast %228 : f32 to vector<2x256xf32>
    %230 = arith.mulf %223, %229 : vector<2x256xf32>
    %231 = arith.addf %213, %230 : vector<2x256xf32>
    %c75 = arith.constant 75 : index
    %232 = memref.load %arg1[%c75] : memref<81xf32, #tpu.memory_space<smem>>
    %233 = vector.broadcast %232 : f32 to vector<2x256xf32>
    %234 = arith.mulf %223, %233 : vector<2x256xf32>
    %235 = arith.addf %217, %234 : vector<2x256xf32>
    %c0_58 = arith.constant 0 : index
    %c0_59 = arith.constant 0 : index
    %c128_60 = arith.constant 128 : index
    %236 = vector.load %arg6[%c0_58, %c0_59, %c128_60] : memref<2x3x512xf32, #tpu.memory_space<vmem>>, vector<2x1x256xf32>
    %237 = vector.shape_cast %236 : vector<2x1x256xf32> to vector<2x256xf32>
    %c4 = arith.constant 4 : index
    %238 = memref.load %arg1[%c4] : memref<81xf32, #tpu.memory_space<smem>>
    %239 = vector.broadcast %238 : f32 to vector<2x256xf32>
    %240 = arith.mulf %237, %239 : vector<2x256xf32>
    %241 = arith.addf %227, %240 : vector<2x256xf32>
    %c31 = arith.constant 31 : index
    %242 = memref.load %arg1[%c31] : memref<81xf32, #tpu.memory_space<smem>>
    %243 = vector.broadcast %242 : f32 to vector<2x256xf32>
    %244 = arith.mulf %237, %243 : vector<2x256xf32>
    %245 = arith.addf %231, %244 : vector<2x256xf32>
    %c58 = arith.constant 58 : index
    %246 = memref.load %arg1[%c58] : memref<81xf32, #tpu.memory_space<smem>>
    %247 = vector.broadcast %246 : f32 to vector<2x256xf32>
    %248 = arith.mulf %237, %247 : vector<2x256xf32>
    %249 = arith.addf %235, %248 : vector<2x256xf32>
    %c0_61 = arith.constant 0 : index
    %c1_62 = arith.constant 1 : index
    %c128_63 = arith.constant 128 : index
    %250 = vector.load %arg6[%c0_61, %c1_62, %c128_63] : memref<2x3x512xf32, #tpu.memory_space<vmem>>, vector<2x1x256xf32>
    %251 = vector.shape_cast %250 : vector<2x1x256xf32> to vector<2x256xf32>
    %c13 = arith.constant 13 : index
    %252 = memref.load %arg1[%c13] : memref<81xf32, #tpu.memory_space<smem>>
    %253 = vector.broadcast %252 : f32 to vector<2x256xf32>
    %254 = arith.mulf %251, %253 : vector<2x256xf32>
    %255 = arith.addf %241, %254 : vector<2x256xf32>
    %c40 = arith.constant 40 : index
    %256 = memref.load %arg1[%c40] : memref<81xf32, #tpu.memory_space<smem>>
    %257 = vector.broadcast %256 : f32 to vector<2x256xf32>
    %258 = arith.mulf %251, %257 : vector<2x256xf32>
    %259 = arith.addf %245, %258 : vector<2x256xf32>
    %c67 = arith.constant 67 : index
    %260 = memref.load %arg1[%c67] : memref<81xf32, #tpu.memory_space<smem>>
    %261 = vector.broadcast %260 : f32 to vector<2x256xf32>
    %262 = arith.mulf %251, %261 : vector<2x256xf32>
    %263 = arith.addf %249, %262 : vector<2x256xf32>
    %c0_64 = arith.constant 0 : index
    %c2_65 = arith.constant 2 : index
    %c128_66 = arith.constant 128 : index
    %264 = vector.load %arg6[%c0_64, %c2_65, %c128_66] : memref<2x3x512xf32, #tpu.memory_space<vmem>>, vector<2x1x256xf32>
    %265 = vector.shape_cast %264 : vector<2x1x256xf32> to vector<2x256xf32>
    %c22 = arith.constant 22 : index
    %266 = memref.load %arg1[%c22] : memref<81xf32, #tpu.memory_space<smem>>
    %267 = vector.broadcast %266 : f32 to vector<2x256xf32>
    %268 = arith.mulf %265, %267 : vector<2x256xf32>
    %269 = arith.addf %255, %268 : vector<2x256xf32>
    %c49 = arith.constant 49 : index
    %270 = memref.load %arg1[%c49] : memref<81xf32, #tpu.memory_space<smem>>
    %271 = vector.broadcast %270 : f32 to vector<2x256xf32>
    %272 = arith.mulf %265, %271 : vector<2x256xf32>
    %273 = arith.addf %259, %272 : vector<2x256xf32>
    %c76 = arith.constant 76 : index
    %274 = memref.load %arg1[%c76] : memref<81xf32, #tpu.memory_space<smem>>
    %275 = vector.broadcast %274 : f32 to vector<2x256xf32>
    %276 = arith.mulf %265, %275 : vector<2x256xf32>
    %277 = arith.addf %263, %276 : vector<2x256xf32>
    %c0_67 = arith.constant 0 : index
    %c0_68 = arith.constant 0 : index
    %c129 = arith.constant 129 : index
    %278 = vector.load %arg6[%c0_67, %c0_68, %c129] : memref<2x3x512xf32, #tpu.memory_space<vmem>>, vector<2x1x256xf32>
    %279 = vector.shape_cast %278 : vector<2x1x256xf32> to vector<2x256xf32>
    %cst_69 = arith.constant 0.000000e+00 : f32
    %280 = vector.shape_cast %25 : vector<1x256xi1> to vector<1x256xi1>
    %281 = vector.broadcast %280 : vector<1x256xi1> to vector<2x256xi1>
    %282 = vector.broadcast %cst_69 : f32 to vector<2x256xf32>
    %283 = arith.select %281, %279, %282 : vector<2x256xi1>, vector<2x256xf32>
    %c5 = arith.constant 5 : index
    %284 = memref.load %arg1[%c5] : memref<81xf32, #tpu.memory_space<smem>>
    %285 = vector.broadcast %284 : f32 to vector<2x256xf32>
    %286 = arith.mulf %283, %285 : vector<2x256xf32>
    %287 = arith.addf %269, %286 : vector<2x256xf32>
    %c32 = arith.constant 32 : index
    %288 = memref.load %arg1[%c32] : memref<81xf32, #tpu.memory_space<smem>>
    %289 = vector.broadcast %288 : f32 to vector<2x256xf32>
    %290 = arith.mulf %283, %289 : vector<2x256xf32>
    %291 = arith.addf %273, %290 : vector<2x256xf32>
    %c59 = arith.constant 59 : index
    %292 = memref.load %arg1[%c59] : memref<81xf32, #tpu.memory_space<smem>>
    %293 = vector.broadcast %292 : f32 to vector<2x256xf32>
    %294 = arith.mulf %283, %293 : vector<2x256xf32>
    %295 = arith.addf %277, %294 : vector<2x256xf32>
    %c0_70 = arith.constant 0 : index
    %c1_71 = arith.constant 1 : index
    %c129_72 = arith.constant 129 : index
    %296 = vector.load %arg6[%c0_70, %c1_71, %c129_72] : memref<2x3x512xf32, #tpu.memory_space<vmem>>, vector<2x1x256xf32>
    %297 = vector.shape_cast %296 : vector<2x1x256xf32> to vector<2x256xf32>
    %cst_73 = arith.constant 0.000000e+00 : f32
    %298 = vector.shape_cast %25 : vector<1x256xi1> to vector<1x256xi1>
    %299 = vector.broadcast %298 : vector<1x256xi1> to vector<2x256xi1>
    %300 = vector.broadcast %cst_73 : f32 to vector<2x256xf32>
    %301 = arith.select %299, %297, %300 : vector<2x256xi1>, vector<2x256xf32>
    %c14 = arith.constant 14 : index
    %302 = memref.load %arg1[%c14] : memref<81xf32, #tpu.memory_space<smem>>
    %303 = vector.broadcast %302 : f32 to vector<2x256xf32>
    %304 = arith.mulf %301, %303 : vector<2x256xf32>
    %305 = arith.addf %287, %304 : vector<2x256xf32>
    %c41 = arith.constant 41 : index
    %306 = memref.load %arg1[%c41] : memref<81xf32, #tpu.memory_space<smem>>
    %307 = vector.broadcast %306 : f32 to vector<2x256xf32>
    %308 = arith.mulf %301, %307 : vector<2x256xf32>
    %309 = arith.addf %291, %308 : vector<2x256xf32>
    %c68 = arith.constant 68 : index
    %310 = memref.load %arg1[%c68] : memref<81xf32, #tpu.memory_space<smem>>
    %311 = vector.broadcast %310 : f32 to vector<2x256xf32>
    %312 = arith.mulf %301, %311 : vector<2x256xf32>
    %313 = arith.addf %295, %312 : vector<2x256xf32>
    %c0_74 = arith.constant 0 : index
    %c2_75 = arith.constant 2 : index
    %c129_76 = arith.constant 129 : index
    %314 = vector.load %arg6[%c0_74, %c2_75, %c129_76] : memref<2x3x512xf32, #tpu.memory_space<vmem>>, vector<2x1x256xf32>
    %315 = vector.shape_cast %314 : vector<2x1x256xf32> to vector<2x256xf32>
    %cst_77 = arith.constant 0.000000e+00 : f32
    %316 = vector.shape_cast %25 : vector<1x256xi1> to vector<1x256xi1>
    %317 = vector.broadcast %316 : vector<1x256xi1> to vector<2x256xi1>
    %318 = vector.broadcast %cst_77 : f32 to vector<2x256xf32>
    %319 = arith.select %317, %315, %318 : vector<2x256xi1>, vector<2x256xf32>
    %c23 = arith.constant 23 : index
    %320 = memref.load %arg1[%c23] : memref<81xf32, #tpu.memory_space<smem>>
    %321 = vector.broadcast %320 : f32 to vector<2x256xf32>
    %322 = arith.mulf %319, %321 : vector<2x256xf32>
    %323 = arith.addf %305, %322 : vector<2x256xf32>
    %c50 = arith.constant 50 : index
    %324 = memref.load %arg1[%c50] : memref<81xf32, #tpu.memory_space<smem>>
    %325 = vector.broadcast %324 : f32 to vector<2x256xf32>
    %326 = arith.mulf %319, %325 : vector<2x256xf32>
    %327 = arith.addf %309, %326 : vector<2x256xf32>
    %c77 = arith.constant 77 : index
    %328 = memref.load %arg1[%c77] : memref<81xf32, #tpu.memory_space<smem>>
    %329 = vector.broadcast %328 : f32 to vector<2x256xf32>
    %330 = arith.mulf %319, %329 : vector<2x256xf32>
    %331 = arith.addf %313, %330 : vector<2x256xf32>
    %c0_78 = arith.constant 0 : index
    %c0_79 = arith.constant 0 : index
    %c143 = arith.constant 143 : index
    %332 = vector.load %arg6[%c0_78, %c0_79, %c143] : memref<2x3x512xf32, #tpu.memory_space<vmem>>, vector<2x1x256xf32>
    %333 = vector.shape_cast %332 : vector<2x1x256xf32> to vector<2x256xf32>
    %cst_80 = arith.constant 0.000000e+00 : f32
    %334 = vector.shape_cast %23 : vector<1x256xi1> to vector<1x256xi1>
    %335 = vector.broadcast %334 : vector<1x256xi1> to vector<2x256xi1>
    %336 = vector.broadcast %cst_80 : f32 to vector<2x256xf32>
    %337 = arith.select %335, %333, %336 : vector<2x256xi1>, vector<2x256xf32>
    %c6 = arith.constant 6 : index
    %338 = memref.load %arg1[%c6] : memref<81xf32, #tpu.memory_space<smem>>
    %339 = vector.broadcast %338 : f32 to vector<2x256xf32>
    %340 = arith.mulf %337, %339 : vector<2x256xf32>
    %341 = arith.addf %323, %340 : vector<2x256xf32>
    %c33 = arith.constant 33 : index
    %342 = memref.load %arg1[%c33] : memref<81xf32, #tpu.memory_space<smem>>
    %343 = vector.broadcast %342 : f32 to vector<2x256xf32>
    %344 = arith.mulf %337, %343 : vector<2x256xf32>
    %345 = arith.addf %327, %344 : vector<2x256xf32>
    %c60 = arith.constant 60 : index
    %346 = memref.load %arg1[%c60] : memref<81xf32, #tpu.memory_space<smem>>
    %347 = vector.broadcast %346 : f32 to vector<2x256xf32>
    %348 = arith.mulf %337, %347 : vector<2x256xf32>
    %349 = arith.addf %331, %348 : vector<2x256xf32>
    %c0_81 = arith.constant 0 : index
    %c1_82 = arith.constant 1 : index
    %c143_83 = arith.constant 143 : index
    %350 = vector.load %arg6[%c0_81, %c1_82, %c143_83] : memref<2x3x512xf32, #tpu.memory_space<vmem>>, vector<2x1x256xf32>
    %351 = vector.shape_cast %350 : vector<2x1x256xf32> to vector<2x256xf32>
    %cst_84 = arith.constant 0.000000e+00 : f32
    %352 = vector.shape_cast %23 : vector<1x256xi1> to vector<1x256xi1>
    %353 = vector.broadcast %352 : vector<1x256xi1> to vector<2x256xi1>
    %354 = vector.broadcast %cst_84 : f32 to vector<2x256xf32>
    %355 = arith.select %353, %351, %354 : vector<2x256xi1>, vector<2x256xf32>
    %c15 = arith.constant 15 : index
    %356 = memref.load %arg1[%c15] : memref<81xf32, #tpu.memory_space<smem>>
    %357 = vector.broadcast %356 : f32 to vector<2x256xf32>
    %358 = arith.mulf %355, %357 : vector<2x256xf32>
    %359 = arith.addf %341, %358 : vector<2x256xf32>
    %c42 = arith.constant 42 : index
    %360 = memref.load %arg1[%c42] : memref<81xf32, #tpu.memory_space<smem>>
    %361 = vector.broadcast %360 : f32 to vector<2x256xf32>
    %362 = arith.mulf %355, %361 : vector<2x256xf32>
    %363 = arith.addf %345, %362 : vector<2x256xf32>
    %c69 = arith.constant 69 : index
    %364 = memref.load %arg1[%c69] : memref<81xf32, #tpu.memory_space<smem>>
    %365 = vector.broadcast %364 : f32 to vector<2x256xf32>
    %366 = arith.mulf %355, %365 : vector<2x256xf32>
    %367 = arith.addf %349, %366 : vector<2x256xf32>
    %c0_85 = arith.constant 0 : index
    %c2_86 = arith.constant 2 : index
    %c143_87 = arith.constant 143 : index
    %368 = vector.load %arg6[%c0_85, %c2_86, %c143_87] : memref<2x3x512xf32, #tpu.memory_space<vmem>>, vector<2x1x256xf32>
    %369 = vector.shape_cast %368 : vector<2x1x256xf32> to vector<2x256xf32>
    %cst_88 = arith.constant 0.000000e+00 : f32
    %370 = vector.shape_cast %23 : vector<1x256xi1> to vector<1x256xi1>
    %371 = vector.broadcast %370 : vector<1x256xi1> to vector<2x256xi1>
    %372 = vector.broadcast %cst_88 : f32 to vector<2x256xf32>
    %373 = arith.select %371, %369, %372 : vector<2x256xi1>, vector<2x256xf32>
    %c24 = arith.constant 24 : index
    %374 = memref.load %arg1[%c24] : memref<81xf32, #tpu.memory_space<smem>>
    %375 = vector.broadcast %374 : f32 to vector<2x256xf32>
    %376 = arith.mulf %373, %375 : vector<2x256xf32>
    %377 = arith.addf %359, %376 : vector<2x256xf32>
    %c51 = arith.constant 51 : index
    %378 = memref.load %arg1[%c51] : memref<81xf32, #tpu.memory_space<smem>>
    %379 = vector.broadcast %378 : f32 to vector<2x256xf32>
    %380 = arith.mulf %373, %379 : vector<2x256xf32>
    %381 = arith.addf %363, %380 : vector<2x256xf32>
    %c78 = arith.constant 78 : index
    %382 = memref.load %arg1[%c78] : memref<81xf32, #tpu.memory_space<smem>>
    %383 = vector.broadcast %382 : f32 to vector<2x256xf32>
    %384 = arith.mulf %373, %383 : vector<2x256xf32>
    %385 = arith.addf %367, %384 : vector<2x256xf32>
    %c0_89 = arith.constant 0 : index
    %c0_90 = arith.constant 0 : index
    %c144 = arith.constant 144 : index
    %386 = vector.load %arg6[%c0_89, %c0_90, %c144] : memref<2x3x512xf32, #tpu.memory_space<vmem>>, vector<2x1x256xf32>
    %387 = vector.shape_cast %386 : vector<2x1x256xf32> to vector<2x256xf32>
    %c7 = arith.constant 7 : index
    %388 = memref.load %arg1[%c7] : memref<81xf32, #tpu.memory_space<smem>>
    %389 = vector.broadcast %388 : f32 to vector<2x256xf32>
    %390 = arith.mulf %387, %389 : vector<2x256xf32>
    %391 = arith.addf %377, %390 : vector<2x256xf32>
    %c34 = arith.constant 34 : index
    %392 = memref.load %arg1[%c34] : memref<81xf32, #tpu.memory_space<smem>>
    %393 = vector.broadcast %392 : f32 to vector<2x256xf32>
    %394 = arith.mulf %387, %393 : vector<2x256xf32>
    %395 = arith.addf %381, %394 : vector<2x256xf32>
    %c61 = arith.constant 61 : index
    %396 = memref.load %arg1[%c61] : memref<81xf32, #tpu.memory_space<smem>>
    %397 = vector.broadcast %396 : f32 to vector<2x256xf32>
    %398 = arith.mulf %387, %397 : vector<2x256xf32>
    %399 = arith.addf %385, %398 : vector<2x256xf32>
    %c0_91 = arith.constant 0 : index
    %c1_92 = arith.constant 1 : index
    %c144_93 = arith.constant 144 : index
    %400 = vector.load %arg6[%c0_91, %c1_92, %c144_93] : memref<2x3x512xf32, #tpu.memory_space<vmem>>, vector<2x1x256xf32>
    %401 = vector.shape_cast %400 : vector<2x1x256xf32> to vector<2x256xf32>
    %c16 = arith.constant 16 : index
    %402 = memref.load %arg1[%c16] : memref<81xf32, #tpu.memory_space<smem>>
    %403 = vector.broadcast %402 : f32 to vector<2x256xf32>
    %404 = arith.mulf %401, %403 : vector<2x256xf32>
    %405 = arith.addf %391, %404 : vector<2x256xf32>
    %c43 = arith.constant 43 : index
    %406 = memref.load %arg1[%c43] : memref<81xf32, #tpu.memory_space<smem>>
    %407 = vector.broadcast %406 : f32 to vector<2x256xf32>
    %408 = arith.mulf %401, %407 : vector<2x256xf32>
    %409 = arith.addf %395, %408 : vector<2x256xf32>
    %c70 = arith.constant 70 : index
    %410 = memref.load %arg1[%c70] : memref<81xf32, #tpu.memory_space<smem>>
    %411 = vector.broadcast %410 : f32 to vector<2x256xf32>
    %412 = arith.mulf %401, %411 : vector<2x256xf32>
    %413 = arith.addf %399, %412 : vector<2x256xf32>
    %c0_94 = arith.constant 0 : index
    %c2_95 = arith.constant 2 : index
    %c144_96 = arith.constant 144 : index
    %414 = vector.load %arg6[%c0_94, %c2_95, %c144_96] : memref<2x3x512xf32, #tpu.memory_space<vmem>>, vector<2x1x256xf32>
    %415 = vector.shape_cast %414 : vector<2x1x256xf32> to vector<2x256xf32>
    %c25 = arith.constant 25 : index
    %416 = memref.load %arg1[%c25] : memref<81xf32, #tpu.memory_space<smem>>
    %417 = vector.broadcast %416 : f32 to vector<2x256xf32>
    %418 = arith.mulf %415, %417 : vector<2x256xf32>
    %419 = arith.addf %405, %418 : vector<2x256xf32>
    %c52 = arith.constant 52 : index
    %420 = memref.load %arg1[%c52] : memref<81xf32, #tpu.memory_space<smem>>
    %421 = vector.broadcast %420 : f32 to vector<2x256xf32>
    %422 = arith.mulf %415, %421 : vector<2x256xf32>
    %423 = arith.addf %409, %422 : vector<2x256xf32>
    %c79 = arith.constant 79 : index
    %424 = memref.load %arg1[%c79] : memref<81xf32, #tpu.memory_space<smem>>
    %425 = vector.broadcast %424 : f32 to vector<2x256xf32>
    %426 = arith.mulf %415, %425 : vector<2x256xf32>
    %427 = arith.addf %413, %426 : vector<2x256xf32>
    %c0_97 = arith.constant 0 : index
    %c0_98 = arith.constant 0 : index
    %c145 = arith.constant 145 : index
    %428 = vector.load %arg6[%c0_97, %c0_98, %c145] : memref<2x3x512xf32, #tpu.memory_space<vmem>>, vector<2x1x256xf32>
    %429 = vector.shape_cast %428 : vector<2x1x256xf32> to vector<2x256xf32>
    %cst_99 = arith.constant 0.000000e+00 : f32
    %430 = vector.shape_cast %25 : vector<1x256xi1> to vector<1x256xi1>
    %431 = vector.broadcast %430 : vector<1x256xi1> to vector<2x256xi1>
    %432 = vector.broadcast %cst_99 : f32 to vector<2x256xf32>
    %433 = arith.select %431, %429, %432 : vector<2x256xi1>, vector<2x256xf32>
    %c8 = arith.constant 8 : index
    %434 = memref.load %arg1[%c8] : memref<81xf32, #tpu.memory_space<smem>>
    %435 = vector.broadcast %434 : f32 to vector<2x256xf32>
    %436 = arith.mulf %433, %435 : vector<2x256xf32>
    %437 = arith.addf %419, %436 : vector<2x256xf32>
    %c35 = arith.constant 35 : index
    %438 = memref.load %arg1[%c35] : memref<81xf32, #tpu.memory_space<smem>>
    %439 = vector.broadcast %438 : f32 to vector<2x256xf32>
    %440 = arith.mulf %433, %439 : vector<2x256xf32>
    %441 = arith.addf %423, %440 : vector<2x256xf32>
    %c62 = arith.constant 62 : index
    %442 = memref.load %arg1[%c62] : memref<81xf32, #tpu.memory_space<smem>>
    %443 = vector.broadcast %442 : f32 to vector<2x256xf32>
    %444 = arith.mulf %433, %443 : vector<2x256xf32>
    %445 = arith.addf %427, %444 : vector<2x256xf32>
    %c0_100 = arith.constant 0 : index
    %c1_101 = arith.constant 1 : index
    %c145_102 = arith.constant 145 : index
    %446 = vector.load %arg6[%c0_100, %c1_101, %c145_102] : memref<2x3x512xf32, #tpu.memory_space<vmem>>, vector<2x1x256xf32>
    %447 = vector.shape_cast %446 : vector<2x1x256xf32> to vector<2x256xf32>
    %cst_103 = arith.constant 0.000000e+00 : f32
    %448 = vector.shape_cast %25 : vector<1x256xi1> to vector<1x256xi1>
    %449 = vector.broadcast %448 : vector<1x256xi1> to vector<2x256xi1>
    %450 = vector.broadcast %cst_103 : f32 to vector<2x256xf32>
    %451 = arith.select %449, %447, %450 : vector<2x256xi1>, vector<2x256xf32>
    %c17 = arith.constant 17 : index
    %452 = memref.load %arg1[%c17] : memref<81xf32, #tpu.memory_space<smem>>
    %453 = vector.broadcast %452 : f32 to vector<2x256xf32>
    %454 = arith.mulf %451, %453 : vector<2x256xf32>
    %455 = arith.addf %437, %454 : vector<2x256xf32>
    %c44 = arith.constant 44 : index
    %456 = memref.load %arg1[%c44] : memref<81xf32, #tpu.memory_space<smem>>
    %457 = vector.broadcast %456 : f32 to vector<2x256xf32>
    %458 = arith.mulf %451, %457 : vector<2x256xf32>
    %459 = arith.addf %441, %458 : vector<2x256xf32>
    %c71 = arith.constant 71 : index
    %460 = memref.load %arg1[%c71] : memref<81xf32, #tpu.memory_space<smem>>
    %461 = vector.broadcast %460 : f32 to vector<2x256xf32>
    %462 = arith.mulf %451, %461 : vector<2x256xf32>
    %463 = arith.addf %445, %462 : vector<2x256xf32>
    %c0_104 = arith.constant 0 : index
    %c2_105 = arith.constant 2 : index
    %c145_106 = arith.constant 145 : index
    %464 = vector.load %arg6[%c0_104, %c2_105, %c145_106] : memref<2x3x512xf32, #tpu.memory_space<vmem>>, vector<2x1x256xf32>
    %465 = vector.shape_cast %464 : vector<2x1x256xf32> to vector<2x256xf32>
    %cst_107 = arith.constant 0.000000e+00 : f32
    %466 = vector.shape_cast %25 : vector<1x256xi1> to vector<1x256xi1>
    %467 = vector.broadcast %466 : vector<1x256xi1> to vector<2x256xi1>
    %468 = vector.broadcast %cst_107 : f32 to vector<2x256xf32>
    %469 = arith.select %467, %465, %468 : vector<2x256xi1>, vector<2x256xf32>
    %c26 = arith.constant 26 : index
    %470 = memref.load %arg1[%c26] : memref<81xf32, #tpu.memory_space<smem>>
    %471 = vector.broadcast %470 : f32 to vector<2x256xf32>
    %472 = arith.mulf %469, %471 : vector<2x256xf32>
    %473 = arith.addf %455, %472 : vector<2x256xf32>
    %c53 = arith.constant 53 : index
    %474 = memref.load %arg1[%c53] : memref<81xf32, #tpu.memory_space<smem>>
    %475 = vector.broadcast %474 : f32 to vector<2x256xf32>
    %476 = arith.mulf %469, %475 : vector<2x256xf32>
    %477 = arith.addf %459, %476 : vector<2x256xf32>
    %c80 = arith.constant 80 : index
    %478 = memref.load %arg1[%c80] : memref<81xf32, #tpu.memory_space<smem>>
    %479 = vector.broadcast %478 : f32 to vector<2x256xf32>
    %480 = arith.mulf %469, %479 : vector<2x256xf32>
    %481 = arith.addf %463, %480 : vector<2x256xf32>
    %482 = vector.shape_cast %473 : vector<2x256xf32> to vector<1x2x256xf32>
    %cst_108 = arith.constant dense<0.000000e+00> : vector<1xf32>
    %483 = vector.multi_reduction <add>, %482, %cst_108 [1, 2] : vector<1x2x256xf32> to vector<1xf32>
    %484 = vector.shape_cast %483 : vector<1xf32> to vector<1x1x1xf32>
    %485 = vector.extract %484[0, 0, 0] : f32 from vector<1x1x1xf32>
    %486 = arith.mulf %473, %473 : vector<2x256xf32>
    %487 = vector.shape_cast %486 : vector<2x256xf32> to vector<1x2x256xf32>
    %cst_109 = arith.constant dense<0.000000e+00> : vector<1xf32>
    %488 = vector.multi_reduction <add>, %487, %cst_109 [1, 2] : vector<1x2x256xf32> to vector<1xf32>
    %489 = vector.shape_cast %488 : vector<1xf32> to vector<1x1x1xf32>
    %490 = vector.extract %489[0, 0, 0] : f32 from vector<1x1x1xf32>
    %cst_110 = arith.constant 0.001953125 : f32
    %491 = arith.mulf %485, %cst_110 : f32
    %cst_111 = arith.constant 0.001953125 : f32
    %492 = arith.mulf %490, %cst_111 : f32
    %493 = arith.mulf %491, %491 : f32
    %494 = arith.subf %492, %493 : f32
    %c0_112 = arith.constant 0 : index
    %495 = memref.load %arg3[%c0_112] : memref<3xf32, #tpu.memory_space<smem>>
    %cst_113 = arith.constant 9.99999974E-6 : f32
    %496 = arith.addf %494, %cst_113 : f32
    %497 = math.rsqrt %496 : f32
    %498 = arith.mulf %495, %497 : f32
    %c0_114 = arith.constant 0 : index
    %499 = memref.load %arg4[%c0_114] : memref<3xf32, #tpu.memory_space<smem>>
    %500 = arith.mulf %491, %498 : f32
    %501 = arith.subf %499, %500 : f32
    %502 = vector.broadcast %498 : f32 to vector<2x256xf32>
    %503 = arith.mulf %473, %502 : vector<2x256xf32>
    %504 = vector.broadcast %501 : f32 to vector<2x256xf32>
    %505 = arith.addf %503, %504 : vector<2x256xf32>
    %cst_115 = arith.constant 0.000000e+00 : f32
    %506 = vector.broadcast %cst_115 : f32 to vector<2x256xf32>
    %507 = arith.maximumf %505, %506 : vector<2x256xf32>
    %c0_116 = arith.constant 0 : index
    %c0_117 = arith.constant 0 : index
    %c0_118 = arith.constant 0 : index
    %508 = vector.load %arg5[%c0_116, %c0_117, %c0_118] : memref<2x3x256xf32, #tpu.memory_space<vmem>>, vector<2x1x256xf32>
    %509 = vector.shape_cast %508 : vector<2x1x256xf32> to vector<2x256xf32>
    %510 = vector.shape_cast %507 : vector<2x256xf32> to vector<2x1x256xf32>
    tpu.vector_store %arg5[%c0_116, %c0_117, %c0_118], %510 {strides = array<i32>} : memref<2x3x256xf32, #tpu.memory_space<vmem>>, vector<2x1x256xf32>,
    %511 = vector.shape_cast %477 : vector<2x256xf32> to vector<1x2x256xf32>
    %cst_119 = arith.constant dense<0.000000e+00> : vector<1xf32>
    %512 = vector.multi_reduction <add>, %511, %cst_119 [1, 2] : vector<1x2x256xf32> to vector<1xf32>
    %513 = vector.shape_cast %512 : vector<1xf32> to vector<1x1x1xf32>
    %514 = vector.extract %513[0, 0, 0] : f32 from vector<1x1x1xf32>
    %515 = arith.mulf %477, %477 : vector<2x256xf32>
    %516 = vector.shape_cast %515 : vector<2x256xf32> to vector<1x2x256xf32>
    %cst_120 = arith.constant dense<0.000000e+00> : vector<1xf32>
    %517 = vector.multi_reduction <add>, %516, %cst_120 [1, 2] : vector<1x2x256xf32> to vector<1xf32>
    %518 = vector.shape_cast %517 : vector<1xf32> to vector<1x1x1xf32>
    %519 = vector.extract %518[0, 0, 0] : f32 from vector<1x1x1xf32>
    %cst_121 = arith.constant 0.001953125 : f32
    %520 = arith.mulf %514, %cst_121 : f32
    %cst_122 = arith.constant 0.001953125 : f32
    %521 = arith.mulf %519, %cst_122 : f32
    %522 = arith.mulf %520, %520 : f32
    %523 = arith.subf %521, %522 : f32
    %c1_123 = arith.constant 1 : index
    %524 = memref.load %arg3[%c1_123] : memref<3xf32, #tpu.memory_space<smem>>
    %cst_124 = arith.constant 9.99999974E-6 : f32
    %525 = arith.addf %523, %cst_124 : f32
    %526 = math.rsqrt %525 : f32
    %527 = arith.mulf %524, %526 : f32
    %c1_125 = arith.constant 1 : index
    %528 = memref.load %arg4[%c1_125] : memref<3xf32, #tpu.memory_space<smem>>
    %529 = arith.mulf %520, %527 : f32
    %530 = arith.subf %528, %529 : f32
    %531 = vector.broadcast %527 : f32 to vector<2x256xf32>
    %532 = arith.mulf %477, %531 : vector<2x256xf32>
    %533 = vector.broadcast %530 : f32 to vector<2x256xf32>
    %534 = arith.addf %532, %533 : vector<2x256xf32>
    %cst_126 = arith.constant 0.000000e+00 : f32
    %535 = vector.broadcast %cst_126 : f32 to vector<2x256xf32>
    %536 = arith.maximumf %534, %535 : vector<2x256xf32>
    %c0_127 = arith.constant 0 : index
    %c1_128 = arith.constant 1 : index
    %c0_129 = arith.constant 0 : index
    %537 = vector.load %arg5[%c0_127, %c1_128, %c0_129] : memref<2x3x256xf32, #tpu.memory_space<vmem>>, vector<2x1x256xf32>
    %538 = vector.shape_cast %537 : vector<2x1x256xf32> to vector<2x256xf32>
    %539 = vector.shape_cast %536 : vector<2x256xf32> to vector<2x1x256xf32>
    tpu.vector_store %arg5[%c0_127, %c1_128, %c0_129], %539 {strides = array<i32>} : memref<2x3x256xf32, #tpu.memory_space<vmem>>, vector<2x1x256xf32>,
    %540 = vector.shape_cast %481 : vector<2x256xf32> to vector<1x2x256xf32>
    %cst_130 = arith.constant dense<0.000000e+00> : vector<1xf32>
    %541 = vector.multi_reduction <add>, %540, %cst_130 [1, 2] : vector<1x2x256xf32> to vector<1xf32>
    %542 = vector.shape_cast %541 : vector<1xf32> to vector<1x1x1xf32>
    %543 = vector.extract %542[0, 0, 0] : f32 from vector<1x1x1xf32>
    %544 = arith.mulf %481, %481 : vector<2x256xf32>
    %545 = vector.shape_cast %544 : vector<2x256xf32> to vector<1x2x256xf32>
    %cst_131 = arith.constant dense<0.000000e+00> : vector<1xf32>
    %546 = vector.multi_reduction <add>, %545, %cst_131 [1, 2] : vector<1x2x256xf32> to vector<1xf32>
    %547 = vector.shape_cast %546 : vector<1xf32> to vector<1x1x1xf32>
    %548 = vector.extract %547[0, 0, 0] : f32 from vector<1x1x1xf32>
    %cst_132 = arith.constant 0.001953125 : f32
    %549 = arith.mulf %543, %cst_132 : f32
    %cst_133 = arith.constant 0.001953125 : f32
    %550 = arith.mulf %548, %cst_133 : f32
    %551 = arith.mulf %549, %549 : f32
    %552 = arith.subf %550, %551 : f32
    %c2_134 = arith.constant 2 : index
    %553 = memref.load %arg3[%c2_134] : memref<3xf32, #tpu.memory_space<smem>>
    %cst_135 = arith.constant 9.99999974E-6 : f32
    %554 = arith.addf %552, %cst_135 : f32
    %555 = math.rsqrt %554 : f32
    %556 = arith.mulf %553, %555 : f32
    %c2_136 = arith.constant 2 : index
    %557 = memref.load %arg4[%c2_136] : memref<3xf32, #tpu.memory_space<smem>>
    %558 = arith.mulf %549, %556 : f32
    %559 = arith.subf %557, %558 : f32
    %560 = vector.broadcast %556 : f32 to vector<2x256xf32>
    %561 = arith.mulf %481, %560 : vector<2x256xf32>
    %562 = vector.broadcast %559 : f32 to vector<2x256xf32>
    %563 = arith.addf %561, %562 : vector<2x256xf32>
    %cst_137 = arith.constant 0.000000e+00 : f32
    %564 = vector.broadcast %cst_137 : f32 to vector<2x256xf32>
    %565 = arith.maximumf %563, %564 : vector<2x256xf32>
    %c0_138 = arith.constant 0 : index
    %c2_139 = arith.constant 2 : index
    %c0_140 = arith.constant 0 : index
    %566 = vector.load %arg5[%c0_138, %c2_139, %c0_140] : memref<2x3x256xf32, #tpu.memory_space<vmem>>, vector<2x1x256xf32>
    %567 = vector.shape_cast %566 : vector<2x1x256xf32> to vector<2x256xf32>
    %568 = vector.shape_cast %565 : vector<2x256xf32> to vector<2x1x256xf32>
    tpu.vector_store %arg5[%c0_138, %c2_139, %c0_140], %568 {strides = array<i32>} : memref<2x3x256xf32, #tpu.memory_space<vmem>>, vector<2x1x256xf32>,
    return
  }
}

</mosaic_0001>

<bundles_post_ra>
// kernel: bug_encoder_forward.1
= control target key start
LH: loop header
LB: loop body
LE: loop exit
PB: predicated region body
PF: predicated region fallthrough
CT: control target
= control target key end

     0   :  { %10 = vsyncpa [#allocation4], 0  ;;  %s3942_s0 = inlined_call_operand.vmem [shape: f32[2,3,256], index: 0, kind: input, shape index: {}]   ;;  %s3943_s1 = inlined_call_operand.vmem [shape: f32[81], index: 1, kind: input, shape index: {}]   ;;  %s3944_s2 = inlined_call_operand.vmem [shape: f32[3], index: 2, kind: input, shape index: {}]   ;;  %s3945_s3 = inlined_call_operand.vmem [shape: f32[3], index: 3, kind: input, shape index: {}]   ;;  %s3946_s4 = inlined_call_operand.vmem [shape: f32[3], index: 4, kind: input, shape index: {}]   ;;  %s3947_s5 = inlined_call_operand.vmem [shape: f32[2,3,256], index: 5, kind: output, shape index: {}]  }
   0x1   :  { %11 = vsyncpa [#allocation6], 0  ;;  %s31_s20 = sshll.u32 %s3944_s2, 4  ;;  %s32_s20 = int_to_ptr.vmem [resolvable:$true] %s31_s20 }
   0x2   :  { %12 = vsyncpa [#allocation9], 0  ;;  %s21_s23 = sshll.u32 %s3943_s1, 4  ;;  %s2643_s24 = scalar_lea.vmem %s32_s20, 16  ;;  %s22_s23 = int_to_ptr.vmem [resolvable:$true] %s21_s23 }
   0x3   :  { %p2644_p0 = scmp.ne.s32.totalorder %s32_s20, %s2643_s24  ;;  %p2648_p1 = scmp.lt.s32.totalorder %s32_s20, %s32_s20 }
   0x4   :  { %p2649_p2 = scmp.lt.s32.totalorder %s2643_s24, %s2643_s24 }
   0x6   :  { %p2650_p3 = por %p2649_p2, %p2648_p1 }
   0x8   :  { %p2651_p4 = pnand %p2650_p3, %p2644_p0 }
   0xa   :  { %2654 = shalt.err (!%p2651_p4)
}
   0xb   :  { %s2697_s25 = smov [#allocation5]   ;;  %s2655_s26 = scalar_lea.vmem %s22_s23, 16 }
   0xc   :  { %34 = dma.vmem_to_smem %s32_s20, 16, %s2697_s25, [#allocation6]  }
   0xd   :  { %p2656_p5 = scmp.ne.s32.totalorder %s22_s23, %s2655_s26  ;;  %p2660_p6 = scmp.lt.s32.totalorder %s22_s23, %s22_s23 }
   0xe   :  { %p2661_p7 = scmp.lt.s32.totalorder %s2655_s26, %s2655_s26 }
  0x10   :  { %p2662_p8 = por %p2661_p7, %p2660_p6 }
  0x12   :  { %p2663_p9 = pnand %p2662_p8, %p2656_p5 }
  0x14   :  { %2666 = shalt.err (!%p2663_p9)
}
  0x15   :  { %s2698_s2 = smov [#allocation3]   ;;  %s41_s28 = sshll.u32 %s3945_s3, 4  ;;  %s42_s28 = int_to_ptr.vmem [resolvable:$true] %s41_s28 }
  0x16   :  { %24 = dma.vmem_to_smem %s22_s23, 16, %s2698_s2, [#allocation4]  }
  0x17   :  { %s51_s6 = sshll.u32 %s3946_s4, 4  ;;  %s2667_s7 = scalar_lea.vmem %s42_s28, 16  ;;  %s52_s6 = int_to_ptr.vmem [resolvable:$true] %s51_s6 }
  0x18   :  { %p2668_p10 = scmp.ne.s32.totalorder %s42_s28, %s2667_s7  ;;  %p2672_p11 = scmp.lt.s32.totalorder %s42_s28, %s42_s28 }
  0x19   :  { %p2673_p12 = scmp.lt.s32.totalorder %s2667_s7, %s2667_s7 }
  0x1b   :  { %p2674_p13 = por %p2673_p12, %p2672_p11 }
  0x1d   :  { %p2675_p0 = pnand %p2674_p13, %p2668_p10 }
  0x1f   :  { %2678 = shalt.err (!%p2675_p0)
}
  0x20   :  { %s2699_s8 = smov [#allocation7]   ;;  %s2679_s9 = scalar_lea.vmem %s52_s6, 16 }
  0x21   :  { %44 = dma.vmem_to_smem %s42_s28, 16, %s2699_s8, [#allocation6]  }
  0x22   :  { %p2680_p1 = scmp.ne.s32.totalorder %s52_s6, %s2679_s9  ;;  %p2684_p2 = scmp.lt.s32.totalorder %s52_s6, %s52_s6 }
  0x23   :  { %p2685_p3 = scmp.lt.s32.totalorder %s2679_s9, %s2679_s9 }
  0x25   :  { %p2686_p4 = por %p2685_p3, %p2684_p2 }
  0x27   :  { %p2687_p5 = pnand %p2686_p4, %p2680_p1 }
  0x29   :  { %2690 = shalt.err (!%p2687_p5)
}
  0x2a   :  { %s2700_s3 = smov [#allocation8]  }
  0x2b   :  { %54 = dma.vmem_to_smem %s52_s6, 16, %s2700_s3, [#allocation9]  }
  0x2c   :  { %2691 = dma.done.wait [#allocation4], 16  }
  0x2d   :  { %2692 = vsyncadd [#allocation4], 4294967280 }
  0x2e   :  { %2693 = dma.done.wait [#allocation6], 32  }
  0x2f   :  { %2694 = vsyncadd [#allocation6], 4294967264 }
  0x30   :  { %2695 = dma.done.wait [#allocation9], 16  }
  0x31   :  { %2696 = vsyncadd [#allocation9], 4294967280 }
  0x32   :  { %67 = sfence }
  0x33   :  { %v72_v0 = vld [vmem:[%s3942_s0] sm:$0x77]  ;;  %v73_v1 = vld [vmem:[%s3942_s0 + $0x8] sm:$0x77]  ;;  %v3948_v2 = vlaneseq  ;;  %v2701_v3 = vmov 0.0   ;;  %s2510_s13 = sld [smem:[#allocation3 + $0x1]] }
  0x34   :  { %68 = vst [vmem:[#allocation2] sm:$0x7] %v2701_v3  ;;  %69 = vst [vmem:[#allocation2 + $0x10] sm:$0x7] %v2701_v3  ;;  %v2702_v4 = vmov 1966171168  }
  0x35   :  { %74 = vst [vmem:[#allocation2 + $0x4] sm:$0x77] %v72_v0  ;;  %75 = vst [vmem:[#allocation2 + $0x14] sm:$0x77] %v73_v1  ;;  %v124_v5 = vunpack.c.l.s4 %v2702_v4  ;;  %v127_v6 = vshrl.u32 %v3948_v2, 7  ;;  %s2762_s14 = sld [smem:[#allocation3 + $0xa]] }
  0x36   :  { %70 = vst [vmem:[#allocation2 + $0xc] sm:$0x7] %v2701_v3  ;;  %71 = vst [vmem:[#allocation2 + $0x1c] sm:$0x7] %v2701_v3  ;;  %s2703_s0 = smov 17   ;;  %s2516_s15 = sld [smem:[#allocation3 + $0x13]] }
  0x37   :  { %v125_v7 = vunpack.c.0.s8 %v124_v5  ;;  %s2704_s16 = smov 16   ;;  %s2705_s17 = smov 15   ;;  %vm152_vm2 = vcmask 138240   ;;  %vm335_vm3 = vcmask 130048   ;;  %vm720_vm4 = vcmask 121856  }
  0x38   :  { %s2706_s18 = smov 1   ;;  %s2707_s19 = smov 127   ;;  %vm895_vm7 = vcmask 7168   ;;  %vm1379_vm8 = vcmask 1039360   ;;  %vm1554_vm9 = vcmask 924672   ;;  %vm1733_vm10 = vcmask 916480  }
  0x39   :  { %v2760_v8 = vsub.s32 %v125_v7, %v127_v6  ;;  %v300_v22 = vstv %s2510_s13  ;;  %s2564_s20 = sld [smem:[#allocation3 + $0x7]]  ;;  %s2708_s22 = smov 113   ;;  %vm2114_vm11 = vcmask 908288   ;;  %vm2255_vm12 = vcmask 1041408  }
  0x3a   :  { %s2871_s21 = sld [smem:[#allocation3 + $0x10]]  ;;  %s2709_s25 = smov 112  }
  0x3b   :  { %v429_v29 = vstv %s2762_s14  ;;  %s2570_s23 = sld [smem:[#allocation3 + $0x19]]  ;;  %s2710_s9 = smov 111  }
  0x3c   :  { %v178_v9 = vld [vmem:[#allocation2 + $0x1] ss:$4 sm:$0x7]  ;;  %v180_v10 = vld [vmem:[#allocation2 + $0x11] ss:$4 sm:$0x7]  ;;  %v557_v53 = vstv %s2516_s15 }
  0x3d   :  { %v183_v11 = vcombine.low %v178_v9, %v180_v10  ;;  %v113_v12 = vld [vmem:[#allocation2] ss:$4 sm:$0x7]  ;;  %v115_v13 = vld [vmem:[#allocation2 + $0x10] ss:$4 sm:$0x7] }
  0x3e   :  { %v122_v14 = vcombine.low %v113_v12, %v115_v13  ;;  %v238_v15 = vld [vmem:[#allocation2 + $0x2] ss:$4 sm:$0x7]  ;;  %v240_v16 = vld [vmem:[#allocation2 + $0x12] ss:$4 sm:$0x7] }
  0x3f   :  { %v190_v17 = vrot.slane %v183_v11, %v2760_v8  ;;  %v243_v18 = vcombine.low %v238_v15, %v240_v16  ;;  %v2766_v20 = vld [vmem:[#allocation2] ss:$4 sm:$0x7]  ;;  %v2768_v21 = vld [vmem:[#allocation2 + $0x10] ss:$4 sm:$0x7] }
  0x40   :  { %v129_v19 = vrot.slane %v122_v14, %v2760_v8  ;;  %v301_v26 = vmul.f32 %v300_v22, %v2766_v20  ;;  %v302_v27 = vmul.f32 %v300_v22, %v2768_v21  ;;  %v2776_v28 = vld [vmem:[#allocation2 + $0x1] ss:$4 sm:$0x7]  ;;  %v2781_v33 = vld [vmem:[#allocation2 + $0x11] ss:$4 sm:$0x7] }
  0x41   :  { %v198_v23 = vrot.slane %v190_v17, %v2760_v8  ;;  %v250_v24 = vrot.slane %v243_v18, %v2760_v8  ;;  %v430_v34 = vmul.f32 %v429_v29, %v2776_v28  ;;  %v431_v38 = vmul.f32 %v429_v29, %v2781_v33  ;;  %v682_v47 = vld [vmem:[#allocation2] ss:$4 sm:$0x7]  ;;  %v683_v48 = vld [vmem:[#allocation2 + $0x10] ss:$4 sm:$0x7] }
  0x42   :  { %v137_v25 = vrot.slane %v129_v19, %v2760_v8  ;;  %v130_v30 = vcombine.high %v129_v19, %v129_v19  ;;  %v305_v37 = vcombine.low %v301_v26, %v302_v27  ;;  %v191_v39 = vcombine.high %v190_v17, %v190_v17  ;;  %v2797_v51 = vld [vmem:[#allocation2 + $0x2] ss:$4 sm:$0x7]  ;;  %v2799_v52 = vld [vmem:[#allocation2 + $0x12] ss:$4 sm:$0x7] }
  0x43   :  { %207 = vrot.lane.b32.xlu1 %v198_v23, %s2703_s0  ;;  %v258_v32 = vrot.slane %v250_v24, %v2760_v8  ;;  %v206_v35 = vcombine.high %v198_v23, %v198_v23  ;;  %v251_v36 = vcombine.high %v250_v24, %v250_v24  ;;  %v434_v43 = vcombine.low %v430_v34, %v431_v38  ;;  %v745_v5 = vld [vmem:[#allocation2 + $0x1] ss:$4 sm:$0x7]  ;;  %v746_v6 = vld [vmem:[#allocation2 + $0x11] ss:$4 sm:$0x7] }
  0x44   :  { %146 = vrot.lane.b32.xlu0 %v137_v25, %s2703_s0  ;;  %v145_v31 = vcombine.high %v137_v25, %v137_v25  ;;  %v144_v40 = vrot.slane %v130_v30, %v2760_v8  ;;  %v312_v42 = vrot.slane %v305_v37, %v2760_v8  ;;  %v205_v44 = vrot.slane %v191_v39, %v2760_v8  ;;  %v803_v12 = vld [vmem:[#allocation2 + $0x2] ss:$4 sm:$0x7]  ;;  %v804_v13 = vld [vmem:[#allocation2 + $0x12] ss:$4 sm:$0x7] }
  0x45   :  { %v265_v41 = vrot.slane %v251_v36, %v2760_v8  ;;  %v441_v46 = vrot.slane %v434_v43, %v2760_v8  ;;  %v266_v49 = vcombine.high %v258_v32, %v258_v32  ;;  %v690_v54 = vcombine.low %v682_v47, %v683_v48  ;;  %v861_v24 = vld [vmem:[#allocation2] ss:$4 sm:$0x7]  ;;  %v862_v25 = vld [vmem:[#allocation2 + $0x10] ss:$4 sm:$0x7] }
  0x46   :  { %v320_v45 = vrot.slane %v312_v42, %v2760_v8  ;;  %v313_v50 = vcombine.high %v312_v42, %v312_v42  ;;  %v558_v57 = vmul.f32 %v557_v53, %v2797_v51  ;;  %v559_v58 = vmul.f32 %v557_v53, %v2799_v52  ;;  %v978_v42 = vld [vmem:[#allocation2 + $0x2] ss:$4 sm:$0x7]  ;;  %v979_v43 = vld [vmem:[#allocation2 + $0x12] ss:$4 sm:$0x7] }
  0x47   :  { %150 = vrot.lane.b32.xlu1 %v145_v31, %s2703_s0  ;;  %v442_v56 = vcombine.high %v441_v46, %v441_v46  ;;  %v697_v61 = vrot.slane %v690_v54, %v2760_v8  ;;  %v449_v63 = vrot.slane %v441_v46, %v2760_v8  ;;  %v749_v10 = vcombine.low %v745_v5, %v746_v6  ;;  %v920_v31 = vld [vmem:[#allocation2 + $0x1] ss:$4 sm:$0x7]  ;;  %v1345_v48 = vld [vmem:[#allocation2 + $0x4] ss:$4 sm:$0x7] }
  0x48   :  { %267 = vrot.lane.b32.xlu0 %v258_v32, %s2703_s0  ;;  %v328_v55 = vcombine.high %v320_v45, %v320_v45  ;;  %v327_v59 = vrot.slane %v313_v50, %v2760_v8  ;;  %v562_v62 = vcombine.low %v558_v57, %v559_v58  ;;  %v807_v16 = vcombine.low %v803_v12, %v804_v13  ;;  %v921_v32 = vld [vmem:[#allocation2 + $0x11] ss:$4 sm:$0x7]  ;;  %s2913_s24 = sld [smem:[#allocation3 + $0x1c]] }
  0x49   :  { %v456_v60 = vrot.slane %v442_v56, %v2760_v8  ;;  %v705_v0 = vrot.slane %v697_v61, %v2760_v8  ;;  %v457_v3 = vcombine.high %v449_v63, %v449_v63  ;;  %v698_v4 = vcombine.high %v697_v61, %v697_v61  ;;  %v1405_v61 = vld [vmem:[#allocation2 + $0x15] ss:$4 sm:$0x7]  ;;  %s2918_s26 = sld [smem:[#allocation3]] }
  0x4a   :  { %v569_v1 = vrot.slane %v562_v62, %v2760_v8  ;;  %v756_v15 = vrot.slane %v749_v10, %v2760_v8  ;;  %v814_v19 = vrot.slane %v807_v16, %v2760_v8  ;;  %v865_v29 = vcombine.low %v861_v24, %v862_v25  ;;  %s2921_s2 = sld [smem:[#allocation5]] }
  0x4b   :  { %211 = vrot.lane.b32.xlu1 %v206_v35, %s2703_s0  ;;  %v713_v7 = vcombine.high %v705_v0, %v705_v0  ;;  %v712_v11 = vrot.slane %v698_v4, %v2760_v8  ;;  %v924_v36 = vcombine.low %v920_v31, %v921_v32  ;;  %v982_v46 = vcombine.low %v978_v42, %v979_v43  ;;  %v1463_v4 = vld [vmem:[#allocation2 + $0x16] ss:$4 sm:$0x7]  ;;  %v1637_v31 = vld [vmem:[#allocation2 + $0x6] ss:$4 sm:$0x7] }
  0x4c   :  { %148 = vrot.lane.b32.xlu0 %v144_v40, %s2703_s0  ;;  %v570_v9 = vcombine.high %v569_v1, %v569_v1  ;;  %v577_v17 = vrot.slane %v569_v1, %v2760_v8  ;;  %v764_v18 = vrot.slane %v756_v15, %v2760_v8  ;;  %v757_v23 = vcombine.high %v756_v15, %v756_v15  ;;  %v1521_v15 = vld [vmem:[#allocation2 + $0x14] ss:$4 sm:$0x7]  ;;  %v1638_v32 = vld [vmem:[#allocation2 + $0x16] ss:$4 sm:$0x7] }
  0x4d   :  { %v815_v27 = vcombine.high %v814_v19, %v814_v19  ;;  %v872_v35 = vrot.slane %v865_v29, %v2760_v8  ;;  %v822_v37 = vrot.slane %v814_v19, %v2760_v8  ;;  %v931_v39 = vrot.slane %v924_v36, %v2760_v8  ;;  %v2877_v36 = vld [vmem:[#allocation2 + $0x4] ss:$4 sm:$0x7]  ;;  %s2923_s1 = sld [smem:[#allocation3 + $0x1b]] }
  0x4e   :  { %v584_v14 = vrot.slane %v570_v9, %v2760_v8  ;;  %v585_v22 = vcombine.high %v577_v17, %v577_v17  ;;  %v772_v26 = vcombine.high %v764_v18, %v764_v18  ;;  %v771_v30 = vrot.slane %v757_v23, %v2760_v8  ;;  %v1580_v23 = vld [vmem:[#allocation2 + $0x15] ss:$4 sm:$0x7]  ;;  %s2928_s27 = sld [smem:[#allocation3 + $0x36]] }
  0x4f   :  { %269 = vrot.lane.b32.xlu1 %v265_v41, %s2703_s0  ;;  %v829_v34 = vrot.slane %v815_v27, %v2760_v8  ;;  %v880_v38 = vrot.slane %v872_v35, %v2760_v8  ;;  %v830_v40 = vcombine.high %v822_v37, %v822_v37  ;;  %v873_v41 = vcombine.high %v872_v35, %v872_v35  ;;  %s2933_s28 = sld [smem:[#allocation3 + $0x9]] }
  0x50   :  { %209 = vrot.lane.b32.xlu0 %v205_v44, %s2703_s0  ;;  %v989_v53 = vrot.slane %v982_v46, %v2760_v8  ;;  %s2937_s29 = sld [smem:[#allocation3 + $0x24]] }
  0x51   :  { %v888_v44 = vcombine.high %v880_v38, %v880_v38  ;;  %v887_v47 = vrot.slane %v873_v41, %v2760_v8  ;;  %s2939_s30 = sld [smem:[#allocation3 + $0x3f]] }
  0x52   :  { %v997_v56 = vrot.slane %v989_v53, %v2760_v8  ;;  %s2947_s6 = sld [smem:[#allocation3 + $0x2d]] }
  0x53   :  { %329 = vrot.lane.b32.xlu1 %v320_v45, %s2704_s16  ;;  %v932_v45 = vcombine.high %v931_v39, %v931_v39  ;;  %s2951_s7 = sld [smem:[#allocation3 + $0x48]] }
  0x54   :  { %271 = vrot.lane.b32.xlu0 %v266_v49, %s2703_s0  ;;  %v1346_v49 = vld [vmem:[#allocation2 + $0x14] ss:$4 sm:$0x7]  ;;  %v1005_v62 = vcombine.high %v997_v56, %v997_v56  ;;  %s2955_s8 = sld [smem:[#allocation3 + $0x25]] }
  0x55   :  { %v946_v50 = vrot.slane %v932_v45, %v2760_v8  ;;  %v1349_v54 = vcombine.low %v1345_v48, %v1346_v49  ;;  %v2891_v49 = vld [vmem:[#allocation2 + $0x5] ss:$4 sm:$0x7]  ;;  %s2973_s3 = sld [smem:[#allocation5 + $0x1]] }
  0x56   :  { %s2983_s4 = sld [smem:[#allocation3 + $0x2e]] }
  0x57   :  { %333 = vrot.lane.b32.xlu1 %v328_v55, %s2704_s16  ;;  %v939_v55 = vrot.slane %v931_v39, %v2760_v8  ;;  %v1356_v57 = vrot.slane %v1349_v54, %v2760_v8  ;;  %v1641_v39 = vcombine.low %v1637_v31, %v1638_v32  ;;  %v2198_v32 = vld [vmem:[#allocation2 + $0x16] ss:$4 sm:$0x7]  ;;  %s2991_s10 = sld [smem:[#allocation5 + $0x2]] }
  0x58   :  { %331 = vrot.lane.b32.xlu0 %v327_v59, %s2704_s16  ;;  %v990_v59 = vcombine.high %v989_v53, %v989_v53  ;;  %v1827_v53 = vstv %s2871_s21  ;;  %s3038_s11 = sld [smem:[#allocation3 + $0x12]] }
  0x59   :  { %v947_v58 = vcombine.high %v939_v55, %v939_v55  ;;  %v1364_v9 = vrot.slane %v1356_v57, %v2760_v8  ;;  %v1648_v46 = vrot.slane %v1641_v39, %v2760_v8  ;;  %s3044_s12 = sld [smem:[#allocation3 + $0x22]] }
  0x5a   :  { %v1004_v1 = vrot.slane %v990_v59, %v2760_v8  ;;  %s3093_s13 = sld [smem:[#allocation3 + $0x2b]] }
  0x5b   :  { %460 = vrot.lane.b32.xlu1 %v456_v60, %s2704_s16  ;;  %v1404_v60 = vld [vmem:[#allocation2 + $0x5] ss:$4 sm:$0x7]  ;;  %v1372_v12 = vcombine.high %v1364_v9, %v1364_v9  ;;  %v1656_v54 = vrot.slane %v1648_v46, %v2760_v8  ;;  %v1649_v59 = vcombine.high %v1648_v46, %v1648_v46  ;;  %s3095_s14 = sld [smem:[#allocation3 + $0x2]] }
  0x5c   :  { %458 = vrot.lane.b32.xlu0 %v449_v63, %s2704_s16  ;;  %v1357_v63 = vcombine.high %v1356_v57, %v1356_v57  ;;  %s3122_s0 = sld [smem:[#allocation3 + $0x28]] }
  0x5d   :  { %s3141_s15 = sld [smem:[#allocation3 + $0x31]] }
  0x5e   :  { %v1371_v5 = vrot.slane %v1357_v63, %v2760_v8  ;;  %v1663_v63 = vrot.slane %v1649_v59, %v2760_v8  ;;  %v172_v59 = vstv %s2928_s27  ;;  %s3227_s21 = sld [smem:[#allocation3 + $0x3]] }
  0x5f   :  { %714 = vrot.lane.b32.xlu1 %v705_v0, %s2705_s17  ;;  %v1408_v0 = vcombine.low %v1404_v60, %v1405_v61  ;;  %v1664_v60 = vcombine.high %v1656_v54, %v1656_v54  ;;  %s3352_s27 = sld [smem:[#allocation3 + $0x6]] }
  0x60   :  { %462 = vrot.lane.b32.xlu0 %v457_v3, %s2704_s16  ;;  %v1462_v3 = vld [vmem:[#allocation2 + $0x6] ss:$4 sm:$0x7] }
  0x61   :  { %v1415_v6 = vrot.slane %v1408_v0, %v2760_v8  ;;  %v2080_v0 = vld [vmem:[#allocation2 + $0x4] ss:$4 sm:$0x7] }
  0x63   :  { %718 = vrot.lane.b32.xlu1 %v713_v7, %s2705_s17  ;;  %v1466_v7 = vcombine.low %v1462_v3, %v1463_v4  ;;  %v1423_v10 = vrot.slane %v1415_v6, %v2760_v8  ;;  %v1416_v13 = vcombine.high %v1415_v6, %v1415_v6 }
  0x64   :  { %716 = vrot.lane.b32.xlu0 %v712_v11, %s2705_s17 }
  0x65   :  { %v1473_v11 = vrot.slane %v1466_v7, %v2760_v8  ;;  %v1431_v16 = vcombine.high %v1423_v10, %v1423_v10  ;;  %v1430_v19 = vrot.slane %v1416_v13, %v2760_v8  ;;  %v1952_v7 = vld [vmem:[#allocation2 + $0x6] ss:$4 sm:$0x7] }
  0x67   :  { %588 = vrot.lane.b32.xlu1 %v584_v14, %s2704_s16  ;;  %v1520_v14 = vld [vmem:[#allocation2 + $0x4] ss:$4 sm:$0x7]  ;;  %v1481_v27 = vrot.slane %v1473_v11, %v2760_v8 }
  0x68   :  { %586 = vrot.lane.b32.xlu0 %v577_v17, %s2704_s16  ;;  %v1474_v17 = vcombine.high %v1473_v11, %v1473_v11  ;;  %v2911_v11 = vand.u32 127, %v3948_v2 }
  0x6a   :  { %v1488_v24 = vrot.slane %v1474_v17, %v2760_v8 }
  0x6b   :  { %773 = vrot.lane.b32.xlu1 %v764_v18, %s2705_s17  ;;  %v1524_v18 = vcombine.low %v1520_v14, %v1521_v15 }
  0x6c   :  { %590 = vrot.lane.b32.xlu0 %v585_v22, %s2704_s16  ;;  %v1579_v22 = vld [vmem:[#allocation2 + $0x5] ss:$4 sm:$0x7] }
  0x6d   :  { %v1531_v25 = vrot.slane %v1524_v18, %v2760_v8  ;;  %v2926_v18 = vadd.s32 128, %v2911_v11 }
  0x6f   :  { %777 = vrot.lane.b32.xlu1 %v772_v26, %s2705_s17  ;;  %v1583_v26 = vcombine.low %v1579_v22, %v1580_v23  ;;  %v1539_v29 = vrot.slane %v1531_v25, %v2760_v8  ;;  %v1532_v35 = vcombine.high %v1531_v25, %v1531_v25  ;;  %v2140_v25 = vld [vmem:[#allocation2 + $0x15] ss:$4 sm:$0x7]  ;;  %v90_v39 = vand.u32 15, %v2926_v18 }
  0x70   :  { %775 = vrot.lane.b32.xlu0 %v771_v30, %s2705_s17 }
  0x71   :  { %v1590_v30 = vrot.slane %v1583_v26, %v2760_v8  ;;  %vm2967_vm1 = vcmp.ge.s32.totalorder %v90_v39, 1  ;;  %vm3132_vm6 = vcmp.le.s32.totalorder %v90_v39, 14 }
  0x73   :  { %833 = vrot.lane.b32.xlu1 %v829_v34, %s2705_s17  ;;  %v1489_v34 = vcombine.high %v1481_v27, %v1481_v27  ;;  %v1591_v41 = vcombine.high %v1590_v30, %v1590_v30  ;;  %v1598_v48 = vrot.slane %v1590_v30, %v2760_v8 }
  0x74   :  { %831 = vrot.lane.b32.xlu0 %v822_v37, %s2705_s17  ;;  %v2879_v37 = vld [vmem:[#allocation2 + $0x14] ss:$4 sm:$0x7] }
  0x75   :  { %v1605_v45 = vrot.slane %v1591_v41, %v2760_v8 }
  0x77   :  { %889 = vrot.lane.b32.xlu1 %v880_v38, %s2706_s18  ;;  %v1698_v38 = vstv %s2564_s20  ;;  %s3223_s20 = sld [smem:[#allocation3 + $0xd]] }
  0x78   :  { %835 = vrot.lane.b32.xlu0 %v830_v40, %s2705_s17  ;;  %v1547_v40 = vcombine.high %v1539_v29, %v1539_v29  ;;  %v1699_v42 = vmul.f32 %v1698_v38, %v2877_v36  ;;  %v1700_v43 = vmul.f32 %v1698_v38, %v2879_v37  ;;  %v83_v38 = vand.u32 15, %v2911_v11  ;;  %s2537_s17 = sld [smem:[#allocation3 + $0x4]] }
  0x7a   :  { %vm2961_vm0 = vcmp.ge.s32.totalorder %v83_v38, 1  ;;  %vm3114_vm5 = vcmp.le.s32.totalorder %v83_v38, 14 }
  0x7b   :  { %893 = vrot.lane.b32.xlu1 %v888_v44, %s2706_s18  ;;  %v1546_v44 = vrot.slane %v1532_v35, %v2760_v8 }
  0x7c   :  { %891 = vrot.lane.b32.xlu0 %v887_v47, %s2706_s18  ;;  %v1703_v47 = vcombine.low %v1699_v42, %v1700_v43 }
  0x7f   :  { %950 = vrot.lane.b32.xlu1 %v946_v50, %s2706_s18  ;;  %v2893_v50 = vld [vmem:[#allocation2 + $0x15] ss:$4 sm:$0x7] }
  0x80   :  { %948 = vrot.lane.b32.xlu0 %v939_v55, %s2706_s18  ;;  %v1710_v55 = vrot.slane %v1703_v47, %v2760_v8  ;;  %v1829_v57 = vmul.f32 %v1827_v53, %v2893_v50 }
  0x82   :  { %v1711_v61 = vcombine.high %v1710_v55, %v1710_v55  ;;  %v1718_v6 = vrot.slane %v1710_v55, %v2760_v8 }
  0x83   :  { %1006 = vrot.lane.b32.xlu1 %v997_v56, %s2706_s18  ;;  %v1828_v56 = vmul.f32 %v1827_v53, %v2891_v49 }
  0x84   :  { %952 = vrot.lane.b32.xlu0 %v947_v58, %s2706_s18  ;;  %v1606_v58 = vcombine.high %v1598_v48, %v1598_v48  ;;  %v1725_v3 = vrot.slane %v1711_v61, %v2760_v8 }
  0x87   :  { %1010 = vrot.lane.b32.xlu1 %v1005_v62, %s2706_s18  ;;  %v1832_v62 = vcombine.low %v1828_v56, %v1829_v57 }
  0x88   :  { %1008 = vrot.lane.b32.xlu0 %v1004_v1, %s2706_s18  ;;  %v2081_v1 = vld [vmem:[#allocation2 + $0x14] ss:$4 sm:$0x7]  ;;  %s3217_s18 = sld [smem:[#allocation3 + $0xb]] }
  0x89   :  { %v1839_v4 = vrot.slane %v1832_v62, %v2760_v8 }
  0x8b   :  { %1375 = vrot.lane.b32.xlu1 %v1371_v5, %s2707_s19  ;;  %v2084_v5 = vcombine.low %v2080_v0, %v2081_v1  ;;  %v1840_v17 = vcombine.high %v1839_v4, %v1839_v4  ;;  %v226_v0 = vstv %s2937_s29  ;;  %v232_v1 = vstv %s2939_s30  ;;  %s3379_s29 = sld [smem:[#allocation3 + $0x18]] }
  0x8c   :  { %1373 = vrot.lane.b32.xlu0 %v1364_v9, %s2707_s19  ;;  %v1953_v9 = vld [vmem:[#allocation2 + $0x16] ss:$4 sm:$0x7]  ;;  %s3471_s30 = sld [smem:[#allocation3 + $0x8]] }
  0x8d   :  { %v2091_v13 = vrot.slane %v2084_v5, %v2760_v8  ;;  %v1854_v26 = vrot.slane %v1840_v17, %v2760_v8 }
  0x8f   :  { %1432 = vrot.lane.b32.xlu1 %v1423_v10, %s2707_s19  ;;  %v1955_v10 = vstv %s2570_s23  ;;  %v2092_v22 = vcombine.high %v2091_v13, %v2091_v13  ;;  %v2099_v41 = vrot.slane %v2091_v13, %v2760_v8  ;;  %s3231_s23 = sld [smem:[#allocation3 + $0x16]] }
  0x90   :  { %1377 = vrot.lane.b32.xlu0 %v1372_v12, %s2707_s19  ;;  %v1847_v12 = vrot.slane %v1839_v4, %v2760_v8  ;;  %v1956_v14 = vmul.f32 %v1955_v10, %v1952_v7  ;;  %v1957_v15 = vmul.f32 %v1955_v10, %v1953_v9 }
  0x91   :  { %v2106_v35 = vrot.slane %v2092_v22, %v2760_v8  ;;  %v2107_v55 = vcombine.high %v2099_v41, %v2099_v41 }
  0x92   :  { %v1960_v23 = vcombine.low %v1956_v14, %v1957_v15  ;;  %v292_v15 = vstv %s2951_s7  ;;  %s3484_s7 = sld [smem:[#allocation3 + $0x1a]] }
  0x93   :  { %1436 = vrot.lane.b32.xlu1 %v1431_v16, %s2707_s19  ;;  %v1726_v16 = vcombine.high %v1718_v6, %v1718_v6 }
  0x94   :  { %1434 = vrot.lane.b32.xlu0 %v1430_v19, %s2707_s19  ;;  %v1855_v19 = vcombine.high %v1847_v12, %v1847_v12 }
  0x97   :  { %1492 = vrot.lane.b32.xlu1 %v1488_v24, %s2707_s19  ;;  %v2139_v24 = vld [vmem:[#allocation2 + $0x5] ss:$4 sm:$0x7] }
  0x98   :  { %1490 = vrot.lane.b32.xlu0 %v1481_v27, %s2707_s19  ;;  %v2143_v31 = vcombine.low %v2139_v24, %v2140_v25 }
  0x9a   :  { %v2150_v47 = vrot.slane %v2143_v31, %v2760_v8 }
  0x9b   :  { %1548 = vrot.lane.b32.xlu1 %v1539_v29, %s2708_s22  ;;  %v2197_v29 = vld [vmem:[#allocation2 + $0x6] ss:$4 sm:$0x7] }
  0x9c   :  { %1494 = vrot.lane.b32.xlu0 %v1489_v34, %s2707_s19  ;;  %v343_v34 = vstv %s2913_s24  ;;  %v2201_v43 = vcombine.low %v2197_v29, %v2198_v32  ;;  %v2989_v7 = vrot.slane %v2150_v47, %v2760_v8  ;;  %v110_v32 = vstv %s2973_s3  ;;  %s3219_s19 = sld [smem:[#allocation3 + $0x14]] }
  0x9d   :  { %s3245_s24 = sld [smem:[#allocation3 + $0x15]] }
  0x9e   :  { %s3531_s3 = sld [smem:[#allocation3 + $0x1d]] }
  0x9f   :  { %1552 = vrot.lane.b32.xlu1 %v1547_v40, %s2708_s22  ;;  %v1967_v40 = vrot.slane %v1960_v23, %v2760_v8 }
  0xa0   :  { %1550 = vrot.lane.b32.xlu0 %v1546_v44, %s2708_s22  ;;  %v344_v44 = vmul.f32 %v343_v34, %v2766_v20 }
  0xa1   :  { %v1975_v53 = vrot.slane %v1967_v40, %v2760_v8  ;;  %v1968_v56 = vcombine.high %v1967_v40, %v1967_v40 }
  0xa3   :  { %1609 = vrot.lane.b32.xlu1 %v1605_v45, %s2708_s22  ;;  %v345_v45 = vmul.f32 %v343_v34, %v2768_v21  ;;  %v108_v21 = vstv %s2921_s2  ;;  %v1983_v5 = vcombine.high %v1975_v53, %v1975_v53  ;;  %s3344_s2 = sld [smem:[#allocation3 + $0xe]] }
  0xa4   :  { %1607 = vrot.lane.b32.xlu0 %v1598_v48, %s2708_s22 }
  0xa5   :  { %v348_v61 = vcombine.low %v344_v44, %v345_v45 }
  0xa7   :  { %1665 = vrot.lane.b32.xlu1 %v1656_v54, %s2708_s22  ;;  %v160_v54 = vstv %s2918_s26  ;;  %v3003_v17 = vrot.slane %v348_v61, %v2760_v8  ;;  %v112_v61 = vstv %s2991_s10  ;;  %s3339_s26 = sld [smem:[#allocation3 + $0x5]] }
  0xa8   :  { %1611 = vrot.lane.b32.xlu0 %v1606_v58, %s2708_s22  ;;  %v166_v58 = vstv %s2923_s1  ;;  %s3350_s1 = sld [smem:[#allocation3 + $0x17]] }
  0xa9   :  { %s3541_s10 = sld [smem:[#allocation3 + $0x40]] }
  0xab   :  { %1669 = vrot.lane.b32.xlu1 %v1664_v60, %s2708_s22  ;;  %v2208_v60 = vrot.slane %v2201_v43, %v2760_v8 }
  0xac   :  { %1667 = vrot.lane.b32.xlu0 %v1663_v63, %s2708_s22  ;;  %v220_v63 = vstv %s2933_s28  ;;  %s3229_s22 = sld [smem:[#allocation3 + $0xc]] }
  0xad   :  { %v2209_v13 = vcombine.high %v2208_v60, %v2208_v60  ;;  %s3369_s28 = sld [smem:[#allocation3 + $0xf]] }
  0xaf   :  { %1729 = vrot.lane.b32.xlu1 %v1725_v3, %s2709_s25  ;;  %v2151_v3 = vcombine.high %v2150_v47, %v2150_v47  ;;  %v2223_v40 = vrot.slane %v2209_v13, %v2760_v8 }
  0xb0   :  { %1727 = vrot.lane.b32.xlu0 %v1718_v6, %s2709_s25  ;;  %v286_v6 = vstv %s2947_s6  ;;  %s3473_s6 = sld [smem:[#allocation3 + $0x11]] }
  0xb1   :  { %v2165_v25 = vrot.slane %v2151_v3, %v2760_v8 }
  0xb3   :  { %1856 = vrot.lane.b32.xlu1 %v1847_v12, %s2709_s25  ;;  %v1982_v12 = vrot.slane %v1968_v56, %v2760_v8 }
  0xb4   :  { %1731 = vrot.lane.b32.xlu0 %v1726_v16, %s2709_s25  ;;  %v3000_v16 = vrot.slane %v2208_v60, %v2760_v8 }
  0xb5   :  { %v2935_v27 = vpop.permute.xlu1 %207 }
  0xb6   :  { %v147_v30 = vpop.permute.xlu0 %146  ;;  %v2224_v31 = vcombine.high %v3000_v16, %v3000_v16 }
  0xb7   :  { %1860 = vrot.lane.b32.xlu1 %v1855_v19, %s2709_s25  ;;  %v471_v19 = vstv %s2955_s8  ;;  %s3506_s8 = sld [smem:[#allocation3 + $0x34]] }
  0xb8   :  { %1858 = vrot.lane.b32.xlu0 %v1854_v26, %s2709_s25  ;;  %v2166_v26 = vcombine.high %v2989_v7, %v2989_v7  ;;  %v473_v45 = vmul.f32 %v471_v19, %v2781_v33 }
  0xb9   :  { %v151_v42 = vpop.permute.xlu1 %150 }
  0xba   :  { %v268_v46 = vpop.permute.xlu0 %267 }
  0xbb   :  { %2110 = vrot.lane.b32.xlu1 %v2106_v35, %s2710_s9 }
  0xbc   :  { %2108 = vrot.lane.b32.xlu0 %v2099_v41, %s2710_s9  ;;  %v472_v41 = vmul.f32 %v471_v19, %v2776_v28 }
  0xbd   :  { %v212_v57 = vpop.permute.xlu1 %211 }
  0xbe   :  { %v149_v62 = vpop.permute.xlu0 %148 }
  0xbf   :  { %v153_v4 = vsel %vm152_vm2, %v147_v30, %v149_v62  ;;  %1984 = vrot.lane.b32.xlu1 %v1975_v53, %s2709_s25  ;;  %v154_v9 = vsel %vm152_vm2, %v149_v62, %v151_v42  ;;  %v599_v53 = vstv %s2983_s4  ;;  %s3533_s4 = sld [smem:[#allocation3 + $0x26]] }
  0xc0   :  { %v157_v10 = vsel %vm2961_vm0, %v153_v4, 0.0  ;;  %2112 = vrot.lane.b32.xlu0 %v2107_v55, %s2710_s9  ;;  %v3012_v29 = vsel %vm2967_vm1, %v154_v9, 0.0  ;;  %v600_v9 = vmul.f32 %v599_v53, %v2797_v51 }
  0xc1   :  { %v270_v14 = vpop.permute.xlu1 %269  ;;  %v167_v22 = vmul.f32 %v166_v58, %v157_v10  ;;  %v173_v47 = vmul.f32 %v172_v59, %v157_v10  ;;  %v174_v56 = vmul.f32 %v172_v59, %v3012_v29  ;;  %v161_v59 = vmul.f32 %v160_v54, %v157_v10 }
  0xc2   :  { %v273_v23 = vsel %vm152_vm2, %v268_v46, %v270_v14  ;;  %v210_v24 = vpop.permute.xlu0 %209  ;;  %v168_v46 = vmul.f32 %v166_v58, %v3012_v29  ;;  %v476_v10 = vcombine.low %v472_v41, %v473_v45 }
  0xc3   :  { %v213_v30 = vsel %vm152_vm2, %v2935_v27, %v210_v24  ;;  %1988 = vrot.lane.b32.xlu1 %v1983_v5, %s2709_s25  ;;  %v214_v34 = vsel %vm152_vm2, %v210_v24, %v212_v57  ;;  %v3028_v27 = vsel %vm2961_vm0, %v273_v23, 0.0  ;;  %v169_v55 = vadd.f32 %v167_v22, %v110_v32 }
  0xc4   :  { %v217_v35 = vsel %vm2961_vm0, %v213_v30, 0.0  ;;  %1986 = vrot.lane.b32.xlu0 %v1982_v12, %s2709_s25  ;;  %v3032_v42 = vsel %vm2967_vm1, %v214_v34, 0.0  ;;  %v287_v3 = vmul.f32 %v286_v6, %v3028_v27  ;;  %v175_v19 = vadd.f32 %v173_v47, %v112_v61 }
  0xc5   :  { %v227_v43 = vmul.f32 %v226_v0, %v217_v35  ;;  %v3034_v44 = vpop.permute.xlu1 %329  ;;  %v233_v57 = vmul.f32 %v232_v1, %v217_v35  ;;  %v228_v33 = vmul.f32 %v226_v0, %v3032_v42  ;;  %v234_v4 = vmul.f32 %v232_v1, %v3032_v42 }
  0xc6   :  { %v272_v28 = vpop.permute.xlu0 %271  ;;  %v601_v0 = vmul.f32 %v599_v53, %v2799_v52  ;;  %v356_v1 = vcombine.high %v3003_v17, %v3003_v17  ;;  %v176_v51 = vadd.f32 %v174_v56, %v112_v61  ;;  %v221_v52 = vmul.f32 %v220_v63, %v217_v35 }
  0xc7   :  { %v274_v60 = vsel %vm152_vm2, %v270_v14, %v272_v28  ;;  %2169 = vrot.lane.b32.xlu1 %v2165_v25, %s2710_s9  ;;  %v229_v62 = vadd.f32 %v227_v43, %v169_v55  ;;  %v235_v23 = vadd.f32 %v233_v57, %v175_v19  ;;  %v293_v24 = vmul.f32 %v292_v15, %v3028_v27 }
  0xc8   :  { %v278_v58 = vsel %vm2967_vm1, %v274_v60, 0.0  ;;  %2167 = vrot.lane.b32.xlu0 %v2989_v7, %s2710_s9  ;;  %v170_v7 = vadd.f32 %v168_v46, %v110_v32  ;;  %v604_v30 = vcombine.low %v600_v9, %v601_v0  ;;  %v236_v32 = vadd.f32 %v234_v4, %v176_v51 }
  0xc9   :  { %v3056_v5 = vpop.permute.xlu1 %333  ;;  %v288_v12 = vmul.f32 %v286_v6, %v278_v58  ;;  %v3062_v14 = vadd.f32 %v287_v3, %v229_v62  ;;  %v294_v22 = vmul.f32 %v292_v15, %v278_v58  ;;  %v280_v34 = vstv %s3038_s11  ;;  %s3543_s11 = sld [smem:[#allocation3 + $0x2f]] }
  0xca   :  { %v3060_v13 = vpop.permute.xlu0 %331  ;;  %v230_v6 = vadd.f32 %v228_v33, %v170_v7  ;;  %v3079_v35 = vadd.f32 %v293_v24, %v235_v23  ;;  %v483_v45 = vrot.slane %v476_v10, %v2760_v8  ;;  %v1741_v15 = vstv %s3044_s12  ;;  %s3553_s12 = sld [smem:[#allocation3 + $0x1e]] }
  0xcb   :  { %2225 = vrot.lane.b32.xlu1 %v3000_v16, %s2710_s9  ;;  %v163_v16 = vadd.f32 %v161_v59, %v108_v21  ;;  %v3085_v46 = vadd.f32 %v294_v22, %v236_v32  ;;  %v162_v47 = vmul.f32 %v160_v54, %v3012_v29  ;;  %v363_v53 = vrot.slane %v3003_v17, %v2760_v8 }
  0xcc   :  { %2171 = vrot.lane.b32.xlu0 %v2166_v26, %s2710_s9  ;;  %v3077_v41 = vadd.f32 %v288_v12, %v230_v6  ;;  %3964 = vst [vmem:[#allocation13_spill] sm:$0xff] %v3079_v35  ;;  %v370_v26 = vrot.slane %v356_v1, %v2760_v8  ;;  %v611_v55 = vrot.slane %v604_v30, %v2760_v8  ;;  %v1869_v0 = vstv %s3093_s13  ;;  %s3561_s13 = sld [smem:[#allocation3 + $0x27]] }
  0xcd   :  { %v3072_v25 = vpop.permute.xlu1 %460  ;;  %3965 = vst [vmem:[#allocation14_spill] sm:$0xff] %v3085_v46  ;;  %v223_v28 = vadd.f32 %v221_v52, %v163_v16  ;;  %v222_v56 = vmul.f32 %v220_v63, %v3032_v42  ;;  %v281_v54 = vmul.f32 %v280_v34, %v3028_v27  ;;  %v1743_v57 = vmul.f32 %v1741_v15, %v2879_v37 }
  0xce   :  { %v459_v43 = vpop.permute.xlu0 %458  ;;  %v491_v17 = vrot.slane %v483_v45, %v2760_v8  ;;  %v371_v60 = vcombine.high %v363_v53, %v363_v53  ;;  %v164_v61 = vadd.f32 %v162_v47, %v108_v21  ;;  %v282_v33 = vmul.f32 %v280_v34, %v278_v58 }
  0xcf   :  { %2229 = vrot.lane.b32.xlu1 %v2224_v31, %s2710_s9  ;;  %v283_v62 = vadd.f32 %v281_v54, %v223_v28  ;;  %v484_v63 = vcombine.high %v483_v45, %v483_v45  ;;  %v336_v27 = vsel %vm335_vm3, %v3034_v44, %v3060_v13  ;;  %v612_v58 = vcombine.high %v611_v55, %v611_v55  ;;  %v3171_v54 = vld [vmem:[#allocation2 + $0x5] ss:$4 sm:$0x3] }
  0xd0   :  { %2227 = vrot.lane.b32.xlu0 %v2223_v40, %s2710_s9  ;;  %v1742_v40 = vmul.f32 %v1741_v15, %v2877_v36  ;;  %v224_v37 = vadd.f32 %v222_v56, %v164_v61  ;;  %v464_v59 = vsel %vm335_vm3, %v459_v43, %v3072_v25  ;;  %v499_v44 = vcombine.high %v491_v17, %v491_v17  ;;  %s3512_s9 = sld [smem:[#allocation3 + $0x1f]] }
  0xd1   :  { %v715_v31 = vpop.permute.xlu1 %714  ;;  %v340_v11 = vadd.f32 %v336_v27, %v283_v62  ;;  %v498_v38 = vrot.slane %v484_v63, %v2760_v8  ;;  %v337_v12 = vsel %vm335_vm3, %v3060_v13, %v3056_v5  ;;  %v728_v19 = vstv %s3095_s14  ;;  %3972 = vst [vmem:[#allocation17_spill] sm:$0xff] %v3171_v54  ;;  %v3186_v63 = vld [vmem:[#allocation2 + $0x6] ss:$4 sm:$0x3]  ;;  %s3567_s14 = sld [smem:[#allocation3 + $0x49]] }
  0xd2   :  { %v463_v29 = vpop.permute.xlu0 %462  ;;  %v1746_v3 = vcombine.low %v1742_v40, %v1743_v57  ;;  %v284_v9 = vadd.f32 %v282_v33, %v224_v37  ;;  %v626_v5 = vrot.slane %v612_v58, %v2760_v8  ;;  %v1870_v6 = vmul.f32 %v1869_v0, %v2891_v49  ;;  %3974 = vst [vmem:[#allocation19_spill] sm:$0xff] %v3186_v63  ;;  %v3188_v27 = vld [vmem:[#allocation2 + $0x16] ss:$4 sm:$0x3] }
  0xd3   :  { %374 = vrot.lane.b32.xlu1 %v370_v26, %s2704_s16  ;;  %v468_v10 = vadd.f32 %v464_v59, %v340_v11  ;;  %v465_v39 = vsel %vm335_vm3, %v3072_v25, %v463_v29  ;;  %v1871_v23 = vmul.f32 %v1869_v0, %v2893_v50  ;;  %v619_v16 = vrot.slane %v611_v55, %v2760_v8  ;;  %v3173_v29 = vld [vmem:[#allocation2 + $0x15] ss:$4 sm:$0x3] }
  0xd4   :  { %372 = vrot.lane.b32.xlu0 %v363_v53, %s2704_s16  ;;  %v1753_v18 = vrot.slane %v1746_v3, %v2760_v8  ;;  %v341_v24 = vadd.f32 %v337_v12, %v284_v9  ;;  %v1177_v47 = vstv %s3122_s0  ;;  %3973 = vst [vmem:[#allocation18_spill] sm:$0xff] %v3173_v29  ;;  %v1280_v40 = vstv %s3141_s15  ;;  %3975 = vst [vmem:[#allocation20_spill] sm:$0xff] %v3188_v27  ;;  %s3569_s0 = sld [smem:[#allocation3 + $0x30]] }
  0xd5   :  { %v719_v36 = vpop.permute.xlu1 %718  ;;  %v1874_v15 = vcombine.low %v1870_v6, %v1871_v23  ;;  %v3182_v61 = vmul.f32 %v1177_v47, %v3173_v29  ;;  %v3195_v37 = vmul.f32 %v1280_v40, %v3188_v27  ;;  %v1247_v9 = vstv %s3231_s23  ;;  %s3572_s15 = sld [smem:[#allocation3 + $0x37]] }
  0xd6   :  { %v717_v21 = vpop.permute.xlu0 %716  ;;  %v469_v43 = vadd.f32 %v465_v39, %v341_v24  ;;  %v1761_v45 = vrot.slane %v1753_v18, %v2760_v8  ;;  %v1754_v55 = vcombine.high %v1753_v18, %v1753_v18  ;;  %v1019_v46 = vstv %s3245_s24  ;;  %s3648_s23 = sld [smem:[#allocation3 + $0x2a]] }
  0xd7   :  { %v721_v4 = vsel %vm720_vm4, %v715_v31, %v717_v21  ;;  %500 = vrot.lane.b32.xlu1 %v491_v17, %s2704_s16  ;;  %v722_v51 = vsel %vm720_vm4, %v717_v21, %v719_v36  ;;  %v627_v31 = vcombine.high %v619_v16, %v619_v16  ;;  %v1881_v62 = vrot.slane %v1874_v15, %v2760_v8  ;;  %s3657_s24 = sld [smem:[#allocation3 + $0x33]] }
  0xd8   :  { %376 = vrot.lane.b32.xlu0 %v371_v60, %s2704_s16  ;;  %v3139_v22 = vsel %vm3114_vm5, %v721_v4, 0.0  ;;  %v3157_v25 = vsel %vm3132_vm6, %v722_v51, 0.0  ;;  %v3179_v60 = vmul.f32 %v1177_v47, %v3171_v54  ;;  %v1769_v33 = vcombine.high %v1761_v45, %v1761_v45  ;;  %3976 = vst [vmem:[#allocation21_spill] sm:$0xff] %v3195_v37 }
  0xd9   :  { %3970 = vst [vmem:[#allocation15_spill] sm:$0xff] %v3139_v22  ;;  %v589_v1 = vpop.permute.xlu1 %588  ;;  %v729_v30 = vmul.f32 %v728_v19, %v3139_v22  ;;  %3971 = vst [vmem:[#allocation16_spill] sm:$0xff] %v3157_v25  ;;  %v730_v28 = vmul.f32 %v728_v19, %v3157_v25  ;;  %v3192_v36 = vmul.f32 %v1280_v40, %v3186_v63  ;;  %v786_v47 = vstv %s3217_s18  ;;  %s3610_s18 = sld [smem:[#allocation3 + $0x20]] }
  0xda   :  { %v587_v52 = vpop.permute.xlu0 %586  ;;  %v1768_v21 = vrot.slane %v1754_v55, %v2760_v8  ;;  %v1889_v4 = vrot.slane %v1881_v62, %v2760_v8  ;;  %v1997_v7 = vstv %s3506_s8  ;;  %s3773_s8 = sld [smem:[#allocation3 + $0x39]] }
  0xdb   :  { %v592_v13 = vsel %vm335_vm3, %v587_v52, %v589_v1  ;;  %504 = vrot.lane.b32.xlu1 %v499_v44, %s2704_s16  ;;  %v1882_v44 = vcombine.high %v1881_v62, %v1881_v62  ;;  %v1144_v62 = vstv %s3223_s20  ;;  %s3621_s20 = sld [smem:[#allocation3 + $0x46]] }
  0xdc   :  { %v596_v32 = vadd.f32 %v592_v13, %v468_v10  ;;  %502 = vrot.lane.b32.xlu0 %v498_v38, %s2704_s16 }
  0xdd   :  { %v3159_v34 = vpop.permute.xlu1 %773  ;;  %v1896_v0 = vrot.slane %v1882_v44, %v2760_v8 }
  0xde   :  { %v3161_v49 = vadd.f32 %v729_v30, %v596_v32  ;;  %v591_v26 = vpop.permute.xlu0 %590 }
  0xdf   :  { %v593_v50 = vsel %vm335_vm3, %v589_v1, %v591_v26  ;;  %630 = vrot.lane.b32.xlu1 %v626_v5, %s2704_s16  ;;  %v1897_v1 = vcombine.high %v1889_v4, %v1889_v4  ;;  %v3237_v26 = vld [vmem:[#allocation2 + $0x4] ss:$4 sm:$0x3] }
  0xe0   :  { %v597_v53 = vadd.f32 %v593_v50, %v469_v43  ;;  %628 = vrot.lane.b32.xlu0 %v619_v16, %s2704_s16  ;;  %v3239_v50 = vld [vmem:[#allocation2 + $0x14] ss:$4 sm:$0x3] }
  0xe1   :  { %v3169_v56 = vpop.permute.xlu1 %777 }
  0xe2   :  { %v3176_v57 = vadd.f32 %v730_v28, %v597_v53  ;;  %v776_v17 = vpop.permute.xlu0 %775 }
  0xe3   :  { %1770 = vrot.lane.b32.xlu1 %v1761_v45, %s2709_s25  ;;  %v779_v43 = vsel %vm720_vm4, %v3159_v34, %v776_v17  ;;  %v1041_v45 = vstv %s2537_s17  ;;  %v780_v53 = vsel %vm720_vm4, %v776_v17, %v3169_v56  ;;  %s3591_s17 = sld [smem:[#allocation3 + $0x3d]] }
  0xe4   :  { %632 = vrot.lane.b32.xlu0 %v627_v31, %s2704_s16  ;;  %v3251_v34 = vsel %vm3114_vm5, %v779_v43, 0.0  ;;  %v1042_v31 = vmul.f32 %v1041_v45, %v3237_v26  ;;  %v1043_v55 = vmul.f32 %v1041_v45, %v3239_v50  ;;  %v3270_v44 = vsel %vm3132_vm6, %v780_v53, 0.0 }
  0xe5   :  { %v834_v58 = vpop.permute.xlu1 %833  ;;  %3977 = vst [vmem:[#allocation22_spill] sm:$0xff] %v3251_v34 }
  0xe6   :  { %v832_v3 = vpop.permute.xlu0 %831 }
  0xe7   :  { %1774 = vrot.lane.b32.xlu1 %v1769_v33, %s2709_s25  ;;  %v837_v28 = vsel %vm720_vm4, %v832_v3, %v834_v58  ;;  %v844_v3 = vstv %s3219_s19  ;;  %s3613_s19 = sld [smem:[#allocation3 + $0x29]] }
  0xe8   :  { %1772 = vrot.lane.b32.xlu0 %v1768_v21, %s2709_s25  ;;  %v3264_v56 = vsel %vm3114_vm5, %v837_v28, 0.0  ;;  %v1046_v28 = vcombine.low %v1042_v31, %v1043_v55 }
  0xe9   :  { %v890_v11 = vpop.permute.xlu1 %889  ;;  %v845_v53 = vmul.f32 %v844_v3, %v3264_v56 }
  0xea   :  { %v836_v38 = vpop.permute.xlu0 %835 }
  0xeb   :  { %1898 = vrot.lane.b32.xlu1 %v1889_v4, %s2709_s25  ;;  %v838_v17 = vsel %vm720_vm4, %v834_v58, %v836_v38  ;;  %v903_v4 = vstv %s3227_s21  ;;  %v1145_v58 = vmul.f32 %v1144_v62, %v3171_v54  ;;  %s3624_s21 = sld [smem:[#allocation3 + $0x32]] }
  0xec   :  { %v3286_v2 = vsel %vm3132_vm6, %v838_v17, 0.0 }
  0xed   :  { %v894_v12 = vpop.permute.xlu1 %893  ;;  %v846_v35 = vmul.f32 %v844_v3, %v3286_v2 }
  0xee   :  { %v892_v19 = vpop.permute.xlu0 %891 }
  0xef   :  { %1900 = vrot.lane.b32.xlu1 %v1896_v0, %s2709_s25  ;;  %v896_v33 = vsel %vm895_vm7, %v890_v11, %v892_v19  ;;  %v787_v0 = vmul.f32 %v786_v47, %v3251_v34  ;;  %v897_v43 = vsel %vm895_vm7, %v892_v19, %v894_v12  ;;  %v788_v19 = vmul.f32 %v786_v47, %v3270_v44 }
  0xf0   :  { %v3278_v45 = vsel %vm2961_vm0, %v896_v33, 0.0  ;;  %v1146_v33 = vmul.f32 %v1144_v62, %v3173_v29  ;;  %v3302_v17 = vsel %vm2967_vm1, %v897_v43, 0.0  ;;  %v1249_v43 = vmul.f32 %v1247_v9, %v3188_v27 }
  0xf1   :  { %v951_v10 = vpop.permute.xlu1 %950  ;;  %v789_v59 = vadd.f32 %v787_v0, %v3161_v49 }
  0xf2   :  { %v949_v51 = vpop.permute.xlu0 %948 }
  0xf3   :  { %1902 = vrot.lane.b32.xlu1 %v1897_v1, %s2709_s25  ;;  %v961_v1 = vstv %s3229_s22  ;;  %v954_v11 = vsel %vm895_vm7, %v949_v51, %v951_v10  ;;  %v847_v49 = vadd.f32 %v845_v53, %v789_v59  ;;  %s3640_s22 = sld [smem:[#allocation3 + $0x21]] }
  0xf4   :  { %v3295_v31 = vsel %vm2961_vm0, %v954_v11, 0.0 }
  0xf5   :  { %v1007_v52 = vpop.permute.xlu1 %1006  ;;  %v962_v62 = vmul.f32 %v961_v1, %v3295_v31 }
  0xf6   :  { %v953_v5 = vpop.permute.xlu0 %952 }
  0xf7   :  { %v955_v55 = vsel %vm895_vm7, %v951_v10, %v953_v5  ;;  %v1248_v10 = vmul.f32 %v1247_v9, %v3186_v63  ;;  %v1149_v63 = vcombine.low %v1145_v58, %v1146_v33 }
  0xf8   :  { %v3318_v0 = vsel %vm2967_vm1, %v955_v55, 0.0 }
  0xf9   :  { %v1011_v18 = vpop.permute.xlu1 %1010  ;;  %v963_v54 = vmul.f32 %v961_v1, %v3318_v0  ;;  %v1252_v37 = vcombine.low %v1248_v10, %v1249_v43  ;;  %v1156_v58 = vrot.slane %v1149_v63, %v2760_v8 }
  0xfa   :  { %v1009_v39 = vpop.permute.xlu0 %1008 }
  0xfb   :  { %v1012_v51 = vsel %vm895_vm7, %v1007_v52, %v1009_v39  ;;  %v904_v52 = vmul.f32 %v903_v4, %v3278_v45  ;;  %v1013_v47 = vsel %vm895_vm7, %v1009_v39, %v1011_v18  ;;  %v790_v18 = vadd.f32 %v788_v19, %v3176_v57 }
  0xfc   :  { %v3310_v11 = vsel %vm2961_vm0, %v1012_v51, 0.0  ;;  %v905_v39 = vmul.f32 %v903_v4, %v3302_v17  ;;  %v1053_v51 = vrot.slane %v1046_v28, %v2760_v8  ;;  %v3328_v59 = vsel %vm2967_vm1, %v1013_v47, 0.0 }
  0xfd   :  { %v3209_v13 = vpop.permute.xlu1 %1375  ;;  %v906_v29 = vadd.f32 %v904_v52, %v847_v49  ;;  %v1020_v53 = vmul.f32 %v1019_v46, %v3310_v11  ;;  %v848_v55 = vadd.f32 %v846_v35, %v790_v18  ;;  %v1021_v28 = vmul.f32 %v1019_v46, %v3328_v59 }
  0xfe   :  { %v3211_v6 = vpop.permute.xlu0 %1373  ;;  %v1054_v19 = vcombine.high %v1053_v51, %v1053_v51  ;;  %v1061_v33 = vrot.slane %v1053_v51, %v2760_v8  ;;  %v1259_v1 = vrot.slane %v1252_v37, %v2760_v8  ;;  %v1157_v46 = vcombine.high %v1156_v58, %v1156_v58 }
  0xff   :  { %v964_v27 = vadd.f32 %v962_v62, %v906_v29  ;;  %v907_v4 = vadd.f32 %v905_v39, %v848_v55  ;;  %v1164_v63 = vrot.slane %v1156_v58, %v2760_v8 }
 0x100   :  { %v1068_v10 = vrot.slane %v1054_v19, %v2760_v8  ;;  %v1171_v18 = vrot.slane %v1157_v46, %v2760_v8  ;;  %v1267_v51 = vrot.slane %v1259_v1, %v2760_v8 }
 0x101   :  { %v3213_v23 = vpop.permute.xlu1 %1432  ;;  %v1022_v52 = vadd.f32 %v1020_v53, %v964_v27  ;;  %v965_v47 = vadd.f32 %v963_v54, %v907_v4  ;;  %v1260_v27 = vcombine.high %v1259_v1, %v1259_v1  ;;  %v1380_v53 = vsel %vm1379_vm8, %v3211_v6, %v3209_v13 }
 0x102   :  { %v3215_v24 = vpop.permute.xlu0 %1377 }
 0x103   :  { %v1023_v49 = vadd.f32 %v1021_v28, %v965_v47  ;;  %v1071_v62 = vadd.f32 %v1061_v33, %v1022_v52  ;;  %v1381_v4 = vsel %vm1379_vm8, %v3209_v13, %v3215_v24  ;;  %v1387_v28 = vstv %s3339_s26  ;;  %s2542_s26 = sld [smem:[#allocation3 + $0x43]] }
 0x104   :  { %v1274_v58 = vrot.slane %v1260_v27, %v2760_v8  ;;  %v1445_v33 = vstv %s3344_s2  ;;  %v3385_v13 = vsel %vm3114_vm5, %v1380_v53, 0.0  ;;  %s2545_s2 = sld [smem:[#allocation3 + $0x4c]] }
 0x105   :  { %v3221_v30 = vpop.permute.xlu1 %1436  ;;  %v1072_v43 = vadd.f32 %v1068_v10, %v1023_v49  ;;  %v1174_v39 = vadd.f32 %v1164_v63, %v1071_v62  ;;  %v1503_v49 = vstv %s3350_s1  ;;  %v1388_v63 = vmul.f32 %v1387_v28, %v3385_v13  ;;  %s3727_s1 = sld [smem:[#allocation3 + $0x2c]] }
 0x106   :  { %v3225_v32 = vpop.permute.xlu0 %1434 }
 0x107   :  { %v1438_v55 = vsel %vm1379_vm8, %v3213_v23, %v3225_v32  ;;  %v1175_v24 = vadd.f32 %v1171_v18, %v1072_v43  ;;  %v1439_v52 = vsel %vm1379_vm8, %v3225_v32, %v3221_v30  ;;  %v1277_v1 = vadd.f32 %v1267_v51, %v1174_v39 }
 0x108   :  { %v3392_v47 = vsel %vm3114_vm5, %v1438_v55, 0.0  ;;  %v1562_v32 = vstv %s3352_s27  ;;  %v3413_v27 = vsel %vm3132_vm6, %v1439_v52, 0.0  ;;  %s3730_s27 = sld [smem:[#allocation3 + $0x35]] }
 0x109   :  { %v3233_v16 = vpop.permute.xlu1 %1492  ;;  %v1278_v39 = vadd.f32 %v1274_v58, %v1175_v24  ;;  %v1390_v53 = vadd.f32 %v1388_v63, %v1277_v1  ;;  %v1620_v58 = vstv %s3369_s28  ;;  %s3741_s28 = sld [smem:[#allocation3 + $0x4f]] }
 0x10a   :  { %v3241_v15 = vpop.permute.xlu0 %1490 }
 0x10b   :  { %v1496_v6 = vsel %vm1379_vm8, %v3241_v15, %v3233_v16  ;;  %v3396_v15 = vsel %vm3132_vm6, %v1381_v4, 0.0 }
 0x10c   :  { %v3404_v46 = vsel %vm3114_vm5, %v1496_v6, 0.0 }
 0x10d   :  { %v3255_v40 = vpop.permute.xlu1 %1548  ;;  %v1504_v55 = vmul.f32 %v1503_v49, %v3404_v46 }
 0x10e   :  { %v3259_v21 = vpop.permute.xlu0 %1494 }
 0x10f   :  { %v1497_v30 = vsel %vm1379_vm8, %v3233_v16, %v3259_v21  ;;  %v1389_v16 = vmul.f32 %v1387_v28, %v3396_v15  ;;  %v1447_v28 = vmul.f32 %v1445_v33, %v3413_v27 }
 0x110   :  { %v3430_v4 = vsel %vm3132_vm6, %v1497_v30, 0.0 }
 0x111   :  { %v3281_v38 = vpop.permute.xlu1 %1552  ;;  %v1505_v30 = vmul.f32 %v1503_v49, %v3430_v4 }
 0x112   :  { %v3290_v12 = vpop.permute.xlu0 %1550 }
 0x113   :  { %v1555_v10 = vsel %vm1554_vm9, %v3255_v40, %v3290_v12  ;;  %v1446_v40 = vmul.f32 %v1445_v33, %v3392_v47  ;;  %v1556_v21 = vsel %vm1554_vm9, %v3290_v12, %v3281_v38  ;;  %v1391_v33 = vadd.f32 %v1389_v16, %v1278_v39 }
 0x114   :  { %v3425_v51 = vsel %vm2961_vm0, %v1555_v10, 0.0  ;;  %v3446_v52 = vsel %vm2967_vm1, %v1556_v21, 0.0 }
 0x115   :  { %v3313_v5 = vpop.permute.xlu1 %1609  ;;  %v1448_v24 = vadd.f32 %v1446_v40, %v1390_v53  ;;  %v1563_v1 = vmul.f32 %v1562_v32, %v3425_v51  ;;  %v1449_v21 = vadd.f32 %v1447_v28, %v1391_v33  ;;  %v1564_v39 = vmul.f32 %v1562_v32, %v3446_v52 }
 0x116   :  { %v3321_v3 = vpop.permute.xlu0 %1607 }
 0x117   :  { %v1613_v43 = vsel %vm1554_vm9, %v3321_v3, %v3313_v5 }
 0x118   :  { %v3439_v38 = vsel %vm2961_vm0, %v1613_v43, 0.0 }
 0x119   :  { %v3332_v9 = vpop.permute.xlu1 %1665  ;;  %v1621_v40 = vmul.f32 %v1620_v58, %v3439_v38 }
 0x11a   :  { %v3334_v57 = vpop.permute.xlu0 %1611 }
 0x11b   :  { %v1614_v12 = vsel %vm1554_vm9, %v3313_v5, %v3334_v57  ;;  %v1506_v57 = vadd.f32 %v1504_v55, %v1448_v24 }
 0x11c   :  { %v3461_v43 = vsel %vm2967_vm1, %v1614_v12, 0.0 }
 0x11d   :  { %v3341_v35 = vpop.permute.xlu1 %1669  ;;  %v1565_v49 = vadd.f32 %v1563_v1, %v1506_v57  ;;  %v1622_v55 = vmul.f32 %v1620_v58, %v3461_v43 }
 0x11e   :  { %v3346_v29 = vpop.permute.xlu0 %1667 }
 0x11f   :  { %v1671_v3 = vsel %vm1554_vm9, %v3332_v9, %v3346_v29  ;;  %v1678_v9 = vstv %s3379_s29  ;;  %v1672_v63 = vsel %vm1554_vm9, %v3346_v29, %v3341_v35  ;;  %v1507_v29 = vadd.f32 %v1505_v30, %v1449_v21  ;;  %s3754_s29 = sld [smem:[#allocation3 + $0x3a]] }
 0x120   :  { %v3456_v5 = vsel %vm2961_vm0, %v1671_v3, 0.0  ;;  %v3466_v53 = vsel %vm2967_vm1, %v1672_v63, 0.0  ;;  %v1623_v3 = vadd.f32 %v1621_v40, %v1565_v49 }
 0x121   :  { %v3354_v54 = vpop.permute.xlu1 %1729  ;;  %v1679_v48 = vmul.f32 %v1678_v9, %v3456_v5  ;;  %v1566_v24 = vadd.f32 %v1564_v39, %v1507_v29  ;;  %v1680_v12 = vmul.f32 %v1678_v9, %v3466_v53 }
 0x122   :  { %v3356_v37 = vpop.permute.xlu0 %1727 }
 0x123   :  { %v1681_v28 = vadd.f32 %v1679_v48, %v1623_v3  ;;  %v1734_v20 = vsel %vm1733_vm10, %v3356_v37, %v3354_v54  ;;  %v1624_v33 = vadd.f32 %v1622_v55, %v1566_v24 }
 0x125   :  { %v3371_v19 = vpop.permute.xlu1 %1856  ;;  %v1682_v30 = vadd.f32 %v1680_v12, %v1624_v33  ;;  %v1738_v63 = vadd.f32 %v1734_v20, %v1681_v28 }
 0x126   :  { %v3381_v23 = vpop.permute.xlu0 %1731 }
 0x127   :  { %v1735_v58 = vsel %vm1733_vm10, %v3354_v54, %v3381_v23 }
 0x128   :  { %v1739_v37 = vadd.f32 %v1735_v58, %v1682_v30  ;;  %v2238_v30 = vstv %s3484_s7  ;;  %s3771_s7 = sld [smem:[#allocation3 + $0x4a]] }
 0x129   :  { %v1861_v62 = vpop.permute.xlu1 %1860 }
 0x12a   :  { %v1859_v18 = vpop.permute.xlu0 %1858 }
 0x12b   :  { %v1862_v57 = vsel %vm1733_vm10, %v3371_v19, %v1859_v18  ;;  %v1863_v40 = vsel %vm1733_vm10, %v1859_v18, %v1861_v62  ;;  %v2122_v19 = vstv %s3471_s30  ;;  %s3757_s30 = sld [smem:[#allocation3 + $0x38]] }
 0x12c   :  { %v1866_v29 = vadd.f32 %v1862_v57, %v1738_v63  ;;  %v1867_v55 = vadd.f32 %v1863_v40, %v1739_v37 }
 0x12d   :  { %v2111_v6 = vpop.permute.xlu1 %2110 }
 0x12e   :  { %v2109_v10 = vpop.permute.xlu0 %2108 }
 0x12f   :  { %v2115_v39 = vsel %vm2114_vm11, %v2109_v10, %v2111_v6 }
 0x130   :  { %v3494_v62 = vsel %vm3114_vm5, %v2115_v39, 0.0 }
 0x131   :  { %v1985_v16 = vpop.permute.xlu1 %1984  ;;  %v2123_v28 = vmul.f32 %v2122_v19, %v3494_v62 }
 0x132   :  { %v2113_v35 = vpop.permute.xlu0 %2112 }
 0x133   :  { %v2116_v49 = vsel %vm2114_vm11, %v2111_v6, %v2113_v35  ;;  %v2180_v6 = vstv %s3473_s6  ;;  %s3765_s6 = sld [smem:[#allocation3 + $0x41]] }
 0x134   :  { %v3498_v18 = vsel %vm3132_vm6, %v2116_v49, 0.0 }
 0x135   :  { %v1989_v32 = vpop.permute.xlu1 %1988 }
 0x136   :  { %v1987_v1 = vpop.permute.xlu0 %1986 }
 0x137   :  { %v1990_v23 = vsel %vm1733_vm10, %v1985_v16, %v1987_v1  ;;  %v1991_v48 = vsel %vm1733_vm10, %v1987_v1, %v1989_v32  ;;  %v2124_v1 = vmul.f32 %v2122_v19, %v3498_v18 }
 0x138   :  { %v1994_v35 = vadd.f32 %v1990_v23, %v1866_v29  ;;  %v1995_v24 = vadd.f32 %v1991_v48, %v1867_v55 }
 0x139   :  { %v2170_v9 = vpop.permute.xlu1 %2169 }
 0x13a   :  { %v2168_v21 = vpop.permute.xlu0 %2167  ;;  %v2126_v57 = vadd.f32 %v2124_v1, %v1995_v24 }
 0x13b   :  { %v2173_v54 = vsel %vm2114_vm11, %v2168_v21, %v2170_v9 }
 0x13c   :  { %v3503_v10 = vsel %vm3114_vm5, %v2173_v54, 0.0 }
 0x13d   :  { %v2226_v3 = vpop.permute.xlu1 %2225  ;;  %v2181_v20 = vmul.f32 %v2180_v6, %v3503_v10 }
 0x13e   :  { %v2172_v16 = vpop.permute.xlu0 %2171 }
 0x13f   :  { %v2174_v12 = vsel %vm2114_vm11, %v2170_v9, %v2172_v16  ;;  %v2125_v9 = vadd.f32 %v2123_v28, %v1994_v35 }
 0x140   :  { %v3510_v32 = vsel %vm3132_vm6, %v2174_v12, 0.0 }
 0x141   :  { %v2182_v33 = vmul.f32 %v2180_v6, %v3510_v32  ;;  %v2230_v58 = vpop.permute.xlu1 %2229  ;;  %v2183_v49 = vadd.f32 %v2181_v20, %v2125_v9  ;;  %v3555_v20 = vld [vmem:[#allocation2 + $0x6] ss:$4 sm:$0x7] }
 0x142   :  { %v2228_v63 = vpop.permute.xlu0 %2227 }
 0x143   :  { %v2231_v40 = vsel %vm2114_vm11, %v2226_v3, %v2228_v63  ;;  %v2232_v21 = vsel %vm2114_vm11, %v2228_v63, %v2230_v58  ;;  %v2184_v54 = vadd.f32 %v2182_v33, %v2126_v57  ;;  %v1074_v3 = vstv %s3512_s9  ;;  %v3558_v58 = vld [vmem:[#allocation2 + $0x16] ss:$4 sm:$0x7]  ;;  %s3778_s9 = sld [smem:[#allocation3 + $0x42]] }
 0x144   :  { %v3523_v37 = vsel %vm3114_vm5, %v2231_v40, 0.0  ;;  %v3527_v39 = vsel %vm3132_vm6, %v2232_v21, 0.0  ;;  %v1998_v33 = vmul.f32 %v3555_v20, %v1997_v7  ;;  %3980 = vst [vmem:[#allocation25_spill] sm:$0xff] %v3558_v58  ;;  %v1075_v40 = vmul.f32 %v1074_v3, %v3237_v26 }
 0x145   :  { %v2239_v23 = vmul.f32 %v2238_v30, %v3523_v37  ;;  %v2240_v48 = vmul.f32 %v2238_v30, %v3527_v39  ;;  %v375_v29 = vpop.permute.xlu1 %374  ;;  %v1999_v30 = vmul.f32 %v3558_v58, %v1997_v7  ;;  %v1076_v21 = vmul.f32 %v1074_v3, %v3239_v50 }
 0x146   :  { %v373_v55 = vpop.permute.xlu0 %372  ;;  %v734_v7 = vstv %s3531_s3  ;;  %v513_v50 = vstv %s3541_s10  ;;  %v792_v3 = vstv %s3533_s4  ;;  %s3783_s3 = sld [smem:[#allocation3 + $0x4b]] }
 0x147   :  { %v3535_v42 = vadd.f32 %v2239_v23, %v2183_v49  ;;  %v3537_v19 = vadd.f32 %v2240_v48, %v2184_v54  ;;  %v378_v49 = vsel %vm335_vm3, %v373_v55, %v375_v29  ;;  %v2002_v48 = vcombine.low %v1998_v33, %v1999_v30  ;;  %s3804_s4 = sld [smem:[#allocation3 + $0x3b]] }
 0x148   :  { %v382_v26 = vadd.f32 %v378_v49, %v3062_v14  ;;  %s3813_s10 = sld [smem:[#allocation3 + $0x44]] }
 0x149   :  { %3978 = vst [vmem:[#allocation23_spill] sm:$0xff] %v3535_v42  ;;  %3979 = vst [vmem:[#allocation24_spill] sm:$0xff] %v3537_v19  ;;  %v501_v6 = vpop.permute.xlu1 %500  ;;  %v2256_v16 = vsel %vm2255_vm12, %v3535_v42, 0.0  ;;  %v2257_v35 = vsel %vm2255_vm12, %v3537_v19, 0.0  ;;  %v2268_v24 = vmul.f32 %v3535_v42, %v3535_v42  ;;  %v2269_v12 = vmul.f32 %v3537_v19, %v3537_v19 }
 0x14a   :  { %v377_v28 = vpop.permute.xlu0 %376  ;;  %v2258_v1 = vadd.f32 %v2257_v35, %v2256_v16  ;;  %v1079_v35 = vcombine.low %v1075_v40, %v1076_v21  ;;  %v2009_v30 = vrot.slane %v2002_v48, %v2760_v8  ;;  %v2632_v21 = vld [vmem:[#allocation2 + $0x11] ss:$4 sm:$0x7]  ;;  %v736_v48 = vmul.f32 %v734_v7, %v3157_v25 }
 0x14b   :  { %v2270_v63 = vsel %vm2255_vm12, %v2268_v24, 0.0  ;;  %v2271_v9 = vsel %vm2255_vm12, %v2269_v12, 0.0  ;;  %v850_v24 = vstv %s3543_s11  ;;  %v379_v12 = vsel %vm335_vm3, %v375_v29, %v377_v28  ;;  %s3823_s11 = sld [smem:[#allocation3 + $0x4d]] }
 0x14c   :  { %2259 = vadd.xlane.f32.xlu0 %v2258_v1  ;;  %v2272_v57 = vadd.f32 %v2271_v9, %v2270_v63  ;;  %v735_v1 = vmul.f32 %v734_v7, %v3139_v22  ;;  %v909_v63 = vstv %s3553_s12  ;;  %v515_v29 = vmul.f32 %v2632_v21, %v513_v50  ;;  %s3827_s12 = sld [smem:[#allocation3 + $0x3c]] }
 0x14d   :  { %v505_v54 = vpop.permute.xlu1 %504  ;;  %v383_v28 = vadd.f32 %v379_v12, %v3077_v41  ;;  %v3588_v49 = vrot.slane %v1079_v35, %v2760_v8  ;;  %v2010_v22 = vcombine.high %v2009_v30, %v2009_v30  ;;  %v2633_v35 = vld [vmem:[#allocation2 + $0x2] ss:$4 sm:$0x7]  ;;  %v851_v58 = vmul.f32 %v850_v24, %v3264_v56 }
 0x14e   :  { %2273 = vadd.xlane.f32.xlu1 %v2272_v57  ;;  %v503_v23 = vpop.permute.xlu0 %502  ;;  %v2631_v57 = vld [vmem:[#allocation2 + $0x1] ss:$4 sm:$0x7] }
 0x14f   :  { %v506_v16 = vsel %vm335_vm3, %v501_v6, %v503_v23  ;;  %v507_v6 = vsel %vm335_vm3, %v503_v23, %v505_v54  ;;  %v514_v40 = vmul.f32 %v2631_v57, %v513_v50  ;;  %v793_v54 = vmul.f32 %v792_v3, %v3251_v34 }
 0x150   :  { %v510_v9 = vadd.f32 %v506_v16, %v382_v26  ;;  %v641_v26 = vstv %s3567_s14  ;;  %v967_v23 = vstv %s3561_s13  ;;  %v511_v19 = vadd.f32 %v507_v6, %v383_v28  ;;  %v2635_v28 = vld [vmem:[#allocation2] ss:$4 sm:$0x7]  ;;  %s3833_s13 = sld [smem:[#allocation3 + $0x45]] }
 0x151   :  { %v631_v55 = vpop.permute.xlu1 %630  ;;  %v385_v50 = vstv %s3572_s15  ;;  %v518_v12 = vcombine.low %v514_v40, %v515_v29  ;;  %v642_v21 = vmul.f32 %v2633_v35, %v641_v26  ;;  %v1094_v7 = vrot.slane %v3588_v49, %v2760_v8  ;;  %s3837_s14 = sld [smem:[#allocation3 + $0x4e]] }
 0x152   :  { %v629_v33 = vpop.permute.xlu0 %628  ;;  %v794_v6 = vmul.f32 %v792_v3, %v3270_v44  ;;  %v910_v40 = vmul.f32 %v909_v63, %v3278_v45  ;;  %v852_v3 = vmul.f32 %v850_v24, %v3286_v2 }
 0x153   :  { %v634_v14 = vsel %vm335_vm3, %v629_v33, %v631_v55  ;;  %v1025_v33 = vstv %s3569_s0 }
 0x154   :  { %v638_v16 = vadd.f32 %v634_v14, %v510_v9  ;;  %v2634_v9 = vld [vmem:[#allocation2 + $0x12] ss:$4 sm:$0x7] }
 0x155   :  { %v643_v14 = vmul.f32 %v2634_v9, %v641_v26  ;;  %v1783_v9 = vstv %s3591_s17 }
 0x156   :  { %v737_v57 = vadd.f32 %v735_v1, %v638_v16  ;;  %v633_v42 = vpop.permute.xlu0 %632  ;;  %v1087_v1 = vcombine.high %v3588_v49, %v3588_v49  ;;  %v386_v16 = vmul.f32 %v2635_v28, %v385_v50  ;;  %v2024_v49 = vrot.slane %v2010_v22, %v2760_v8  ;;  %v3982_v22 = vld [vmem:[#allocation21_spill] sm:$0xff] }
 0x157   :  { %v635_v41 = vsel %vm335_vm3, %v631_v55, %v633_v42  ;;  %v3981_v42 = vcombine.low %v3179_v60, %v3182_v61  ;;  %v646_v60 = vcombine.low %v642_v21, %v643_v14  ;;  %v968_v61 = vmul.f32 %v967_v23, %v3295_v31 }
 0x158   :  { %v795_v25 = vadd.f32 %v793_v54, %v737_v57  ;;  %v639_v34 = vadd.f32 %v635_v41, %v511_v19  ;;  %v2636_v19 = vld [vmem:[#allocation2 + $0x10] ss:$4 sm:$0x7]  ;;  %v3617_v57 = vrot.slane %v518_v12, %v2760_v8  ;;  %v3983_v24 = vcombine.low %v3192_v36, %v3982_v22 }
 0x159   :  { %v1189_v55 = vrot.slane %v3981_v42, %v2760_v8  ;;  %v387_v54 = vmul.f32 %v2636_v19, %v385_v50  ;;  %v1026_v50 = vmul.f32 %v1025_v33, %v3310_v11  ;;  %v2638_v42 = vld [vmem:[#allocation2 + $0x14] ss:$4 sm:$0x7]  ;;  %v969_v36 = vmul.f32 %v967_v23, %v3318_v0 }
 0x15a   :  { %v853_v29 = vadd.f32 %v851_v58, %v795_v25  ;;  %v738_v26 = vadd.f32 %v736_v48, %v639_v34  ;;  %v911_v25 = vmul.f32 %v909_v63, %v3302_v17  ;;  %v2017_v34 = vrot.slane %v2009_v30, %v2760_v8  ;;  %v2637_v30 = vld [vmem:[#allocation2 + $0x4] ss:$4 sm:$0x7] }
 0x15b   :  { %v1190_v58 = vcombine.high %v1189_v55, %v1189_v55  ;;  %v1292_v48 = vrot.slane %v3983_v24, %v2760_v8  ;;  %v390_v14 = vcombine.low %v386_v16, %v387_v54  ;;  %v533_v63 = vrot.slane %v3617_v57, %v2760_v8 }
 0x15c   :  { %v912_v41 = vadd.f32 %v910_v40, %v853_v29  ;;  %v796_v35 = vadd.f32 %v794_v6, %v738_v26  ;;  %v3636_v6 = vrot.slane %v646_v60, %v2760_v8  ;;  %v1784_v28 = vmul.f32 %v2637_v30, %v1783_v9 }
 0x15d   :  { %v1785_v40 = vmul.f32 %v2638_v42, %v1783_v9  ;;  %v1197_v19 = vrot.slane %v1189_v55, %v2760_v8  ;;  %v1101_v16 = vrot.slane %v1087_v1, %v2760_v8  ;;  %v2025_v54 = vcombine.high %v2017_v34, %v2017_v34 }
 0x15e   :  { %v970_v12 = vadd.f32 %v968_v61, %v912_v41  ;;  %v854_v21 = vadd.f32 %v852_v3, %v796_v35  ;;  %v1293_v3 = vcombine.high %v1292_v48, %v1292_v48  ;;  %v1027_v60 = vmul.f32 %v1025_v33, %v3328_v59 }
 0x15f   :  { %2028 = vrot.lane.b32.xlu1 %v2024_v49, %s2709_s25  ;;  %v1300_v49 = vrot.slane %v1292_v48, %v2760_v8  ;;  %v397_v23 = vrot.slane %v390_v14, %v2760_v8  ;;  %v1393_v55 = vstv %s3610_s18  ;;  %v541_v1 = vcombine.high %v533_v63, %v533_v63 }
 0x160   :  { %v1028_v29 = vadd.f32 %v1026_v50, %v970_v12  ;;  %v913_v26 = vadd.f32 %v911_v25, %v854_v21  ;;  %v654_v35 = vcombine.high %v3636_v6, %v3636_v6  ;;  %v1788_v9 = vcombine.low %v1784_v28, %v1785_v40  ;;  %v2639_v28 = vld [vmem:[#allocation2 + $0x5] ss:$4 sm:$0x7]  ;;  %v2640_v40 = vld [vmem:[#allocation2 + $0x15] ss:$4 sm:$0x7] }
 0x161   :  { %v1204_v33 = vrot.slane %v1190_v58, %v2760_v8  ;;  %v1451_v24 = vstv %s3613_s19  ;;  %v1509_v48 = vstv %s3624_s21  ;;  %v398_v50 = vcombine.high %v397_v23, %v397_v23  ;;  %s2286_s21 = sld [smem:[#allocation7]] }
 0x162   :  { %v1104_v61 = vadd.f32 %v1094_v7, %v1028_v29  ;;  %v971_v41 = vadd.f32 %v969_v36, %v913_v26  ;;  %2026 = vrot.lane.b32.xlu0 %v2017_v34, %s2709_s25  ;;  %v1911_v7 = vstv %s3621_s20  ;;  %v1307_v34 = vrot.slane %v1293_v3, %v2760_v8 }
 0x163   :  { %542 = vrot.lane.b32.xlu1 %v533_v63, %s2704_s16  ;;  %v1394_v12 = vmul.f32 %v1393_v55, %v3385_v13  ;;  %v405_v14 = vrot.slane %v397_v23, %v2760_v8  ;;  %v668_v58 = vrot.slane %v654_v35, %v2760_v8  ;;  %v3666_v30 = vrot.slane %v1788_v9, %v2760_v8 }
 0x164   :  { %v1029_v25 = vadd.f32 %v1027_v60, %v971_v41  ;;  %v1207_v22 = vadd.f32 %v1197_v19, %v1104_v61  ;;  %v1912_v42 = vmul.f32 %v2639_v28, %v1911_v7  ;;  %v1913_v36 = vmul.f32 %v2640_v40, %v1911_v7 }
 0x165   :  { %v1452_v29 = vmul.f32 %v1451_v24, %v3392_v47  ;;  %v1395_v3 = vmul.f32 %v1393_v55, %v3396_v15  ;;  %v1626_v41 = vstv %s3648_s23  ;;  %v1803_v23 = vrot.slane %v3666_v30, %v2760_v8 }
 0x166   :  { %v1105_v21 = vadd.f32 %v1101_v16, %v1029_v25  ;;  %2030 = vrot.lane.b32.xlu0 %v2025_v54, %s2709_s25  ;;  %v1310_v63 = vadd.f32 %v1300_v49, %v1207_v22  ;;  %v1568_v16 = vstv %s3640_s22  ;;  %v412_v54 = vrot.slane %v398_v50, %v2760_v8  ;;  %s2292_s22 = sld [smem:[#allocation8]] }
 0x167   :  { %546 = vrot.lane.b32.xlu1 %v541_v1, %s2704_s16  ;;  %v1510_v49 = vmul.f32 %v1509_v48, %v3404_v46  ;;  %v1916_v1 = vcombine.low %v1912_v42, %v1913_v36  ;;  %v1453_v35 = vmul.f32 %v1451_v24, %v3413_v27  ;;  %v1569_v9 = vmul.f32 %v1568_v16, %v3425_v51 }
 0x168   :  { %v1208_v26 = vadd.f32 %v1204_v33, %v1105_v21  ;;  %v1396_v19 = vadd.f32 %v1394_v12, %v1310_v63  ;;  %v1684_v55 = vstv %s3657_s24  ;;  %v413_v22 = vcombine.high %v405_v14, %v405_v14 }
 0x169   :  { %v526_v7 = vcombine.high %v3617_v57, %v3617_v57  ;;  %v1627_v50 = vmul.f32 %v1626_v41, %v3439_v38  ;;  %v1811_v24 = vcombine.high %v1803_v23, %v1803_v23  ;;  %v1923_v63 = vrot.slane %v1916_v1, %v2760_v8 }
 0x16a   :  { %414 = vrot.lane.b32.xlu0 %v405_v14, %s2704_s16  ;;  %v1311_v60 = vadd.f32 %v1307_v34, %v1208_v26  ;;  %v1454_v61 = vadd.f32 %v1452_v29, %v1396_v19  ;;  %v1511_v34 = vmul.f32 %v1509_v48, %v3430_v4  ;;  %v1685_v14 = vmul.f32 %v1684_v55, %v3456_v5 }
 0x16b   :  { %672 = vrot.lane.b32.xlu1 %v668_v58, %s2704_s16  ;;  %v1570_v58 = vmul.f32 %v1568_v16, %v3446_v52  ;;  %v1628_v57 = vmul.f32 %v1626_v41, %v3461_v43  ;;  %v540_v36 = vrot.slane %v526_v7, %v2760_v8  ;;  %v1931_v29 = vrot.slane %v1923_v63, %v2760_v8 }
 0x16c   :  { %v1397_v25 = vadd.f32 %v1395_v3, %v1311_v60  ;;  %v1512_v33 = vadd.f32 %v1510_v49, %v1454_v61  ;;  %v1924_v26 = vcombine.high %v1923_v63, %v1923_v63  ;;  %v1686_v19 = vmul.f32 %v1684_v55, %v3466_v53 }
 0x16d   :  { %v661_v3 = vrot.slane %v3636_v6, %v2760_v8  ;;  %v1796_v61 = vcombine.high %v3666_v30, %v3666_v30  ;;  %v1939_v41 = vcombine.high %v1931_v29, %v1931_v29  ;;  %v1313_v6 = vstv %s2545_s2  ;;  %v3986_v30 = vld [vmem:[#allocation19_spill] sm:$0xff] }
 0x16e   :  { %v1455_v12 = vadd.f32 %v1453_v35, %v1397_v25  ;;  %v1571_v21 = vadd.f32 %v1569_v9, %v1512_v33  ;;  %416 = vrot.lane.b32.xlu0 %v412_v54, %s2704_s16  ;;  %v1938_v49 = vrot.slane %v1924_v26, %v2760_v8  ;;  %v3984_v35 = vld [vmem:[#allocation17_spill] sm:$0xff]  ;;  %v3985_v25 = vld [vmem:[#allocation18_spill] sm:$0xff]  ;;  %v3716_v55 = vmul.f32 %v1313_v6, %v3986_v30 }
 0x16f   :  { %1812 = vrot.lane.b32.xlu1 %v1803_v23, %s2709_s25  ;;  %v669_v60 = vcombine.high %v661_v3, %v661_v3  ;;  %v1210_v23 = vstv %s2542_s26  ;;  %v1810_v1 = vrot.slane %v1796_v61, %v2760_v8 }
 0x170   :  { %v1513_v28 = vadd.f32 %v1511_v34, %v1455_v12  ;;  %v1629_v42 = vadd.f32 %v1627_v50, %v1571_v21  ;;  %v3709_v9 = vmul.f32 %v1210_v23, %v3984_v35  ;;  %v3712_v33 = vmul.f32 %v1210_v23, %v3985_v25  ;;  %v1771_v12 = vpop.permute.xlu1 %1770 }
 0x171   :  { %v2186_v35 = vstv %s3727_s1  ;;  %s2587_s1 = sld [smem:[#allocation7 + $0x2]] }
 0x172   :  { %v1572_v48 = vadd.f32 %v1570_v58, %v1513_v28  ;;  %v1687_v40 = vadd.f32 %v1685_v14, %v1629_v42  ;;  %418 = vrot.lane.b32.xlu0 %v413_v22, %s2704_s16  ;;  %v3987_v22 = vld [vmem:[#allocation20_spill] sm:$0xff]  ;;  %v1215_v34 = vcombine.low %v3709_v9, %v3712_v33  ;;  %v1773_v58 = vpop.permute.xlu0 %1772 }
 0x173   :  { %1816 = vrot.lane.b32.xlu1 %v1811_v24, %s2709_s25  ;;  %v3719_v7 = vmul.f32 %v1313_v6, %v3987_v22  ;;  %v1776_v28 = vsel %vm1733_vm10, %v1771_v12, %v1773_v58 }
 0x174   :  { %v1630_v16 = vadd.f32 %v1628_v57, %v1572_v48  ;;  %v1775_v21 = vpop.permute.xlu1 %1774 }
 0x175   :  { %v1318_v50 = vcombine.low %v3716_v55, %v3719_v7  ;;  %v1777_v57 = vsel %vm1733_vm10, %v1773_v58, %v1775_v21 }
 0x176   :  { %v1688_v54 = vadd.f32 %v1686_v19, %v1630_v16  ;;  %544 = vrot.lane.b32.xlu0 %v540_v36, %s2704_s16  ;;  %v1780_v36 = vadd.f32 %v1776_v28, %v1687_v40 }
 0x177   :  { %1940 = vrot.lane.b32.xlu1 %v1931_v29, %s2709_s25  ;;  %v1325_v9 = vrot.slane %v1318_v50, %v2760_v8 }
 0x178   :  { %v1899_v24 = vpop.permute.xlu1 %1898 }
 0x179   :  { %v1326_v50 = vcombine.high %v1325_v9, %v1325_v9 }
 0x17a   :  { %670 = vrot.lane.b32.xlu0 %v661_v3, %s2704_s16  ;;  %v1781_v3 = vadd.f32 %v1777_v57, %v1688_v54  ;;  %v2244_v54 = vstv %s3730_s27  ;;  %s3872_s27 = sld [smem:[#allocation3 + $0x3e]] }
 0x17b   :  { %1942 = vrot.lane.b32.xlu1 %v1938_v49, %s2709_s25 }
 0x17c   :  { %v1901_v63 = vpop.permute.xlu1 %1900 }
 0x17d   :  { %v1904_v26 = vsel %vm1733_vm10, %v1899_v24, %v1901_v63 }
 0x17e   :  { %674 = vrot.lane.b32.xlu0 %v669_v60, %s2704_s16  ;;  %s3725_s16 = sld [smem:[#allocation3 + $0x23]] }
 0x17f   :  { %1944 = vrot.lane.b32.xlu1 %v1939_v41, %s2709_s25 }
 0x180   :  { %v1903_v14 = vpop.permute.xlu1 %1902 }
 0x181   :  { %v1905_v61 = vsel %vm1733_vm10, %v1901_v63, %v1903_v14  ;;  %v2187_v14 = vmul.f32 %v2186_v35, %v3503_v10 }
 0x182   :  { %1814 = vrot.lane.b32.xlu0 %v1810_v1, %s2709_s25  ;;  %v1908_v1 = vadd.f32 %v1904_v26, %v1780_v36  ;;  %v1909_v12 = vadd.f32 %v1905_v61, %v1781_v3  ;;  %v2188_v26 = vmul.f32 %v2186_v35, %v3510_v32 }
 0x184   :  { %v2128_v60 = vstv %s3725_s16 }
 0x185   :  { %v2129_v22 = vmul.f32 %v2128_v60, %v3494_v62  ;;  %v2130_v63 = vmul.f32 %v2128_v60, %v3498_v18 }
 0x1d5   :  { %v2260_v42 = vpop.xlane.xlu0 %2259 }
 0x1d6   :  { %v2261_v48 = vrot.slane %v2260_v42, 4 }
 0x1d7   :  { %v2274_v29 = vpop.xlane.xlu1 %2273 }
 0x1d8   :  { %v2262_v19 = vadd.f32 %v2261_v48, %v2260_v42  ;;  %v2275_v16 = vrot.slane %v2274_v29, 4 }
 0x1d9   :  { %v2027_v49 = vpop.permute.xlu0 %2026 }
 0x1da   :  { %v2263_v41 = vrot.slane %v2262_v19, 2  ;;  %v2276_v23 = vadd.f32 %v2275_v16, %v2274_v29 }
 0x1db   :  { %v2029_v6 = vpop.permute.xlu1 %2028 }
 0x1dc   :  { %v2277_v25 = vrot.slane %v2276_v23, 2  ;;  %v2032_v30 = vsel %vm1733_vm10, %v2027_v49, %v2029_v6  ;;  %v2264_v40 = vadd.f32 %v2263_v41, %v2262_v19  ;;  %v2245_v19 = vmul.f32 %v2244_v54, %v3523_v37 }
 0x1dd   :  { %v2036_v21 = vadd.f32 %v2032_v30, %v1908_v1  ;;  %v2031_v24 = vpop.permute.xlu0 %2030  ;;  %v2246_v41 = vmul.f32 %v2244_v54, %v3527_v39  ;;  %v2039_v30 = vstv %s3741_s28 }
 0x1de   :  { %v2033_v58 = vsel %vm1733_vm10, %v2029_v6, %v2031_v24  ;;  %v2265_v28 = vrot.slane %v2264_v40, 1  ;;  %v2278_v42 = vadd.f32 %v2277_v25, %v2276_v23 }
 0x1df   :  { %v2131_v57 = vadd.f32 %v2129_v22, %v2036_v21  ;;  %v2037_v48 = vadd.f32 %v2033_v58, %v1909_v12  ;;  %v543_v1 = vpop.permute.xlu1 %542 }
 0x1e0   :  { %v2266_v36 = vadd.f32 %v2265_v28, %v2264_v40  ;;  %v2279_v29 = vrot.slane %v2278_v42, 1 }
 0x1e1   :  { %v2189_v16 = vadd.f32 %v2187_v14, %v2131_v57  ;;  %v2132_v3 = vadd.f32 %v2130_v63, %v2037_v48  ;;  %v415_v49 = vpop.permute.xlu0 %414  ;;  %v3988_v63 = vld [vmem:[#allocation25_spill] sm:$0xff] }
 0x1e2   :  { %2591 = vpush %v2266_v36  ;;  %v2280_v61 = vadd.f32 %v2279_v29, %v2278_v42  ;;  %v2040_v42 = vmul.f32 %v3555_v20, %v2039_v30  ;;  %v2041_v14 = vmul.f32 %v3988_v63, %v2039_v30  ;;  %v3989_v20 = vld [vmem:[#allocation13_spill] sm:$0xff]  ;;  %v3991_v63 = vld [vmem:[#allocation14_spill] sm:$0xff] }
 0x1e3   :  { %v3748_v23 = vadd.f32 %v2245_v19, %v2189_v16  ;;  %v2190_v60 = vadd.f32 %v2188_v26, %v2132_v3  ;;  %v547_v28 = vpop.permute.xlu1 %546  ;;  %v1107_v19 = vstv %s3754_s29 }
 0x1e4   :  { %2593 = vpush %v2280_v61  ;;  %v2044_v29 = vcombine.low %v2040_v42, %v2041_v14  ;;  %v740_v61 = vstv %s3757_s30  ;;  %s3879_s30 = sld [smem:[#allocation3 + $0x47]] }
 0x1e5   :  { %v3750_v6 = vadd.f32 %v2246_v41, %v2190_v60  ;;  %v417_v25 = vpop.permute.xlu0 %416  ;;  %v2349_v35 = vmul.f32 %v3748_v23, %v3748_v23  ;;  %v2337_v40 = vsel %vm2255_vm12, %v3748_v23, 0.0  ;;  %v798_v41 = vstv %s3765_s6  ;;  %s3882_s6 = sld [smem:[#allocation3 + $0x50]] }
 0x1e6   :  { %v420_v48 = vsel %vm335_vm3, %v415_v49, %v417_v25 }
 0x1e7   :  { %v2338_v22 = vsel %vm2255_vm12, %v3750_v6, 0.0  ;;  %v2350_v12 = vmul.f32 %v3750_v6, %v3750_v6  ;;  %v2351_v54 = vsel %vm2255_vm12, %v2349_v35, 0.0  ;;  %v424_v16 = vadd.f32 %v420_v48, %v3989_v20  ;;  %v673_v3 = vpop.permute.xlu1 %672  ;;  %v2641_v35 = vld [vmem:[#allocation2 + $0x4] ss:$4 sm:$0x3] }
 0x1e8   :  { %v2339_v21 = vadd.f32 %v2338_v22, %v2337_v40  ;;  %v1108_v30 = vmul.f32 %v2641_v35, %v1107_v19  ;;  %v2642_v40 = vld [vmem:[#allocation2 + $0x14] ss:$4 sm:$0x3]  ;;  %v3992_v48 = vld [vmem:[#allocation22_spill] sm:$0xff] }
 0x1e9   :  { %v419_v24 = vpop.permute.xlu0 %418  ;;  %v2352_v58 = vsel %vm2255_vm12, %v2350_v12, 0.0  ;;  %v1109_v22 = vmul.f32 %v2642_v40, %v1107_v19  ;;  %v2051_v12 = vrot.slane %v2044_v29, %v2760_v8 }
 0x1ea   :  { %2340 = vadd.xlane.f32.xlu0 %v2339_v21  ;;  %v2353_v57 = vadd.f32 %v2352_v58, %v2351_v54  ;;  %v421_v60 = vsel %vm335_vm3, %v417_v25, %v419_v24  ;;  %v3990_v58 = vld [vmem:[#allocation15_spill] sm:$0xff]  ;;  %v799_v25 = vmul.f32 %v798_v41, %v3992_v48  ;;  %v856_v24 = vstv %s3771_s7 }
 0x1eb   :  { %v741_v42 = vmul.f32 %v740_v61, %v3990_v58  ;;  %v425_v14 = vadd.f32 %v421_v60, %v3991_v63  ;;  %v1112_v19 = vcombine.low %v1108_v30, %v1109_v22  ;;  %v2052_v29 = vcombine.high %v2051_v12, %v2051_v12 }
 0x1ec   :  { %2354 = vadd.xlane.f32.xlu1 %v2353_v57  ;;  %v973_v63 = vstv %s3778_s9  ;;  %v1031_v48 = vstv %s3783_s3 }
 0x1ed   :  { %v545_v36 = vpop.permute.xlu0 %544 }
 0x1ee   :  { %v548_v26 = vsel %vm335_vm3, %v543_v1, %v545_v36  ;;  %v549_v21 = vsel %vm335_vm3, %v545_v36, %v547_v28  ;;  %v3993_v36 = vld [vmem:[#allocation16_spill] sm:$0xff] }
 0x1ef   :  { %v552_v49 = vadd.f32 %v548_v26, %v424_v16  ;;  %v915_v26 = vstv %s3773_s8  ;;  %v553_v20 = vadd.f32 %v549_v21, %v425_v14  ;;  %v742_v40 = vmul.f32 %v740_v61, %v3993_v36 }
 0x1f0   :  { %v1119_v21 = vrot.slane %v1112_v19, %v2760_v8  ;;  %v1333_v19 = vrot.slane %v1325_v9, %v2760_v8 }
 0x1f1   :  { %v671_v1 = vpop.permute.xlu0 %670 }
 0x1f2   :  { %v676_v54 = vsel %vm335_vm3, %v671_v1, %v673_v3  ;;  %v857_v1 = vmul.f32 %v856_v24, %v3264_v56  ;;  %v974_v56 = vmul.f32 %v973_v63, %v3295_v31 }
 0x1f3   :  { %v680_v57 = vadd.f32 %v676_v54, %v552_v49  ;;  %v800_v49 = vmul.f32 %v798_v41, %v3270_v44  ;;  %v916_v54 = vmul.f32 %v915_v26, %v3278_v45  ;;  %v1222_v44 = vrot.slane %v1215_v34, %v2760_v8 }
 0x1f4   :  { %v917_v45 = vmul.f32 %v915_v26, %v3302_v17  ;;  %v1032_v41 = vmul.f32 %v1031_v48, %v3310_v11  ;;  %v975_v17 = vmul.f32 %v973_v63, %v3318_v0  ;;  %v1033_v26 = vmul.f32 %v1031_v48, %v3328_v59 }
 0x1f5   :  { %v743_v16 = vadd.f32 %v741_v42, %v680_v57  ;;  %v675_v35 = vpop.permute.xlu0 %674  ;;  %v2066_v42 = vrot.slane %v2052_v29, %v2760_v8  ;;  %v1120_v57 = vcombine.high %v1119_v21, %v1119_v21  ;;  %v1223_v34 = vcombine.high %v1222_v44, %v1222_v44 }
 0x1f6   :  { %v677_v28 = vsel %vm335_vm3, %v673_v3, %v675_v35  ;;  %v858_v3 = vmul.f32 %v856_v24, %v3286_v2  ;;  %v2059_v2 = vrot.slane %v2051_v12, %v2760_v8  ;;  %v1230_v12 = vrot.slane %v1222_v44, %v2760_v8 }
 0x1f7   :  { %v801_v58 = vadd.f32 %v799_v25, %v743_v16  ;;  %v681_v60 = vadd.f32 %v677_v28, %v553_v20  ;;  %v1127_v25 = vrot.slane %v1119_v21, %v2760_v8  ;;  %v1134_v20 = vrot.slane %v1120_v57, %v2760_v8 }
 0x1f8   :  { %v2067_v55 = vcombine.high %v2059_v2, %v2059_v2  ;;  %v1399_v16 = vstv %s3804_s4  ;;  %v1237_v59 = vrot.slane %v1223_v34, %v2760_v8  ;;  %v1457_v28 = vstv %s3813_s10 }
 0x1f9   :  { %v859_v30 = vadd.f32 %v857_v1, %v801_v58  ;;  %v744_v22 = vadd.f32 %v742_v40, %v681_v60  ;;  %v1400_v36 = vmul.f32 %v1399_v16, %v3385_v13  ;;  %v1340_v1 = vrot.slane %v1326_v50, %v2760_v8 }
 0x1fa   :  { %v1515_v60 = vstv %s3823_s11  ;;  %v1574_v48 = vstv %s3827_s12  ;;  %v1401_v21 = vmul.f32 %v1399_v16, %v3396_v15  ;;  %v1459_v13 = vmul.f32 %v1457_v28, %v3413_v27  ;;  %s2583_s12 = sld [smem:[#allocation7 + $0x1]] }
 0x1fb   :  { %v918_v61 = vadd.f32 %v916_v54, %v859_v30  ;;  %v802_v14 = vadd.f32 %v800_v49, %v744_v22  ;;  %v1458_v49 = vmul.f32 %v1457_v28, %v3392_v47  ;;  %v1516_v30 = vmul.f32 %v1515_v60, %v3404_v46 }
 0x1fc   :  { %v1690_v44 = vstv %s3837_s14  ;;  %v1576_v15 = vmul.f32 %v1574_v48, %v3446_v52 }
 0x1fd   :  { %v976_v24 = vadd.f32 %v974_v56, %v918_v61  ;;  %v860_v31 = vadd.f32 %v858_v3, %v802_v14  ;;  %2070 = vrot.lane.b32.xlu1 %v2066_v42, %s2709_s25  ;;  %v1632_v3 = vstv %s3833_s13  ;;  %v1575_v56 = vmul.f32 %v1574_v48, %v3425_v51  ;;  %s2584_s13 = sld [smem:[#allocation8 + $0x1]] }
 0x1fe   :  { %v1633_v47 = vmul.f32 %v1632_v3, %v3439_v38  ;;  %v1691_v46 = vmul.f32 %v1690_v44, %v3456_v5  ;;  %v1692_v51 = vmul.f32 %v1690_v44, %v3466_v53  ;;  %v1813_v5 = vpop.permute.xlu1 %1812 }
 0x1ff   :  { %v1034_v11 = vadd.f32 %v1032_v41, %v976_v24  ;;  %v919_v33 = vadd.f32 %v917_v45, %v860_v31  ;;  %v1517_v45 = vmul.f32 %v1515_v60, %v3430_v4  ;;  %v1634_v24 = vmul.f32 %v1632_v3, %v3461_v43 }
 0x200   :  { %2068 = vrot.lane.b32.xlu0 %v2059_v2, %s2709_s25 }
 0x201   :  { %v1137_v7 = vadd.f32 %v1127_v25, %v1034_v11  ;;  %v977_v0 = vadd.f32 %v975_v17, %v919_v33  ;;  %v3994_v17 = vld [vmem:[#allocation23_spill] sm:$0xff]  ;;  %v3995_v33 = vld [vmem:[#allocation24_spill] sm:$0xff] }
 0x202   :  { %v1817_v43 = vpop.permute.xlu1 %1816 }
 0x203   :  { %v1035_v35 = vadd.f32 %v1033_v26, %v977_v0  ;;  %v1240_v29 = vadd.f32 %v1230_v12, %v1137_v7 }
 0x204   :  { %2072 = vrot.lane.b32.xlu0 %v2067_v55, %s2709_s25 }
 0x205   :  { %v1138_v40 = vadd.f32 %v1134_v20, %v1035_v35  ;;  %v1343_v58 = vadd.f32 %v1333_v19, %v1240_v29  ;;  %v3996_v35 = vlaneseq }
 0x206   :  { %v1941_v26 = vpop.permute.xlu1 %1940 }
 0x207   :  { %v1241_v54 = vadd.f32 %v1237_v59, %v1138_v40  ;;  %v1402_v63 = vadd.f32 %v1400_v36, %v1343_v58  ;;  %vm3861_vm13 = vcmp.lt.s32.totalorder %v3996_v35, 256  ;;  %v1815_v36 = vpop.permute.xlu0 %1814 }
 0x208   :  { %v1818_v58 = vsel %vm1733_vm10, %v1813_v5, %v1815_v36 }
 0x209   :  { %v1344_v22 = vadd.f32 %v1340_v1, %v1241_v54  ;;  %v1460_v42 = vadd.f32 %v1458_v49, %v1402_v63  ;;  %v1819_v49 = vsel %vm1733_vm10, %v1815_v36, %v1817_v43 }
 0x20a   :  { %v1943_v19 = vpop.permute.xlu1 %1942 }
 0x20b   :  { %v1403_v61 = vadd.f32 %v1401_v21, %v1344_v22  ;;  %v1518_v14 = vadd.f32 %v1516_v30, %v1460_v42  ;;  %v1946_v21 = vsel %vm1733_vm10, %v1941_v26, %v1943_v19 }
 0x20d   :  { %v1461_v41 = vadd.f32 %v1459_v13, %v1403_v61  ;;  %v1577_v57 = vadd.f32 %v1575_v56, %v1518_v14  ;;  %v2134_v13 = vstv %s3872_s27  ;;  %s2588_s27 = sld [smem:[#allocation8 + $0x2]] }
 0x20e   :  { %v1945_v1 = vpop.permute.xlu1 %1944 }
 0x20f   :  { %v1519_v2 = vadd.f32 %v1517_v45, %v1461_v41  ;;  %v1635_v25 = vadd.f32 %v1633_v47, %v1577_v57  ;;  %v1947_v56 = vsel %vm1733_vm10, %v1943_v19, %v1945_v1  ;;  %v2192_v47 = vstv %s3879_s30 }
 0x211   :  { %v1578_v27 = vadd.f32 %v1576_v15, %v1519_v2  ;;  %v1693_v31 = vadd.f32 %v1691_v46, %v1635_v25  ;;  %v2135_v46 = vmul.f32 %v2134_v13, %v3494_v62 }
 0x213   :  { %v1636_v9 = vadd.f32 %v1634_v24, %v1578_v27  ;;  %s2592_s25 = spop %2591  ;;  %v1822_v63 = vadd.f32 %v1818_v58, %v1693_v31  ;;  %v2250_v27 = vstv %s3882_s6 }
 0x214   :  { %s2282_s0 = smul.f32 0.001953125, %s2592_s25  ;;  %v2251_v62 = vmul.f32 %v2250_v27, %v3523_v37 }
 0x215   :  { %v1694_v4 = vadd.f32 %v1692_v51, %v1636_v9  ;;  %s2594_s15 = spop %2593  ;;  %v1950_v44 = vadd.f32 %v1946_v21, %v1822_v63 }
 0x216   :  { %s2284_s17 = smul.f32 %s2282_s0, %s2282_s0 }
 0x217   :  { %s2283_s18 = smul.f32 0.001953125, %s2594_s15  ;;  %v1823_v42 = vadd.f32 %v1819_v49, %v1694_v4  ;;  %v2136_v4 = vmul.f32 %v2134_v13, %v3498_v18 }
 0x219   :  { %s2285_s19 = ssub.f32 %s2283_s18, %s2284_s17  ;;  %v1951_v2 = vadd.f32 %v1947_v56, %v1823_v42 }
 0x21b   :  { %s2287_s20 = sadd.f32 1e-05, %s2285_s19 }
 0x21d   :  { %v2288_v38 = vstv %s2287_s20 }
 0x21e   :  { %2623 = vrsqrt.f32 %v2288_v38  ;;  %v2193_v38 = vmul.f32 %v2192_v47, %v3503_v10 }
 0x22b   :  { %v2624_v52 = vpop.eup %2623 }
 0x22c   :  { %2595 = vpush %v2624_v52 }
 0x25d   :  { %s2596_s23 = spop %2595 }
 0x25e   :  { %s2291_s24 = smul.f32 %s2596_s23, %s2286_s21 }
 0x260   :  { %s2293_s26 = smul.f32 %s2291_s24, %s2282_s0  ;;  %v2295_v53 = vstv %s2291_s24 }
 0x261   :  { %v2296_v11 = vmul.f32 %v2295_v53, %v3994_v17  ;;  %v2297_v34 = vmul.f32 %v2295_v53, %v3995_v33  ;;  %v2194_v17 = vmul.f32 %v2192_v47, %v3510_v32 }
 0x262   :  { %s2294_s2 = ssub.f32 %s2292_s22, %s2293_s26 }
 0x264   :  { %v2298_v12 = vstv %s2294_s2 }
 0x265   :  { %v2299_v20 = vadd.f32 %v2298_v12, %v2296_v11  ;;  %v2300_v55 = vadd.f32 %v2298_v12, %v2297_v34  ;;  %v2252_v12 = vmul.f32 %v2250_v27, %v3527_v39 }
 0x267   :  { %v2301_v7 = vmax.f32 %v2299_v20, 0.0  ;;  %v2302_v0 = vmax.f32 %v2300_v55, 0.0 }
 0x269   :  { %v2305_v50 = vcombine.low %v2301_v7, %v2302_v0 }
 0x26b   :  { %v2312_v16 = vrot.slane %v2305_v50, %v2760_v8 }
 0x26d   :  { %v2313_v29 = vcombine.high %v2312_v16, %v2312_v16  ;;  %v2320_v28 = vrot.slane %v2312_v16, %v2760_v8 }
 0x26f   :  { %v2327_v40 = vrot.slane %v2313_v29, %v2760_v8  ;;  %2334 = vst.msk [vmem:[%s3947_s5] ss:$4 sm:$0x3] %vm3861_vm13, %v2320_v28 }
 0x271   :  { %2582 = vst.msk [vmem:[%s3947_s5 + $0x8] ss:$4 sm:$0x3] %vm3861_vm13, %v2327_v40 }
 0x273   :  { %v2341_v60 = vpop.xlane.xlu0 %2340 }
 0x274   :  { %v2342_v54 = vrot.slane %v2341_v60, 4 }
 0x275   :  { %v2355_v48 = vpop.xlane.xlu1 %2354 }
 0x276   :  { %v2343_v30 = vadd.f32 %v2342_v54, %v2341_v60  ;;  %v2356_v22 = vrot.slane %v2355_v48, 4 }
 0x277   :  { %v2069_v3 = vpop.permute.xlu0 %2068 }
 0x278   :  { %v2344_v61 = vrot.slane %v2343_v30, 2  ;;  %v2357_v14 = vadd.f32 %v2356_v22, %v2355_v48 }
 0x279   :  { %v2071_v45 = vpop.permute.xlu1 %2070 }
 0x27a   :  { %v2358_v41 = vrot.slane %v2357_v14, 2  ;;  %v2074_v57 = vsel %vm1733_vm10, %v2069_v3, %v2071_v45  ;;  %v2345_v15 = vadd.f32 %v2344_v61, %v2343_v30 }
 0x27b   :  { %v2078_v25 = vadd.f32 %v2074_v57, %v1950_v44  ;;  %v2073_v24 = vpop.permute.xlu0 %2072 }
 0x27c   :  { %v2075_v31 = vsel %vm1733_vm10, %v2071_v45, %v2073_v24  ;;  %v2346_v51 = vrot.slane %v2345_v15, 1  ;;  %v2359_v9 = vadd.f32 %v2358_v41, %v2357_v14 }
 0x27d   :  { %v2137_v52 = vadd.f32 %v2135_v46, %v2078_v25  ;;  %v2079_v5 = vadd.f32 %v2075_v31, %v1951_v2 }
 0x27e   :  { %v2347_v43 = vadd.f32 %v2346_v51, %v2345_v15  ;;  %v2360_v53 = vrot.slane %v2359_v9, 1 }
 0x27f   :  { %v2195_v11 = vadd.f32 %v2193_v38, %v2137_v52  ;;  %v2138_v33 = vadd.f32 %v2136_v4, %v2079_v5 }
 0x280   :  { %2597 = vpush %v2347_v43  ;;  %v2361_v34 = vadd.f32 %v2360_v53, %v2359_v9 }
 0x281   :  { %v3898_v26 = vadd.f32 %v2251_v62, %v2195_v11  ;;  %v2196_v20 = vadd.f32 %v2194_v17, %v2138_v33 }
 0x282   :  { %2599 = vpush %v2361_v34 }
 0x283   :  { %v3900_v18 = vadd.f32 %v2252_v12, %v2196_v20  ;;  %v2427_v10 = vmul.f32 %v3898_v26, %v3898_v26  ;;  %v2415_v32 = vsel %vm2255_vm12, %v3898_v26, 0.0 }
 0x285   :  { %v2416_v37 = vsel %vm2255_vm12, %v3900_v18, 0.0  ;;  %v2428_v55 = vmul.f32 %v3900_v18, %v3900_v18  ;;  %v2429_v39 = vsel %vm2255_vm12, %v2427_v10, 0.0 }
 0x286   :  { %v2417_v7 = vadd.f32 %v2416_v37, %v2415_v32 }
 0x287   :  { %v2430_v0 = vsel %vm2255_vm12, %v2428_v55, 0.0 }
 0x288   :  { %2418 = vadd.xlane.f32.xlu0 %v2417_v7  ;;  %v2431_v50 = vadd.f32 %v2430_v0, %v2429_v39 }
 0x28a   :  { %2432 = vadd.xlane.f32.xlu1 %v2431_v50 }
 0x2b1   :  { %s2598_s7 = spop %2597 }
 0x2b2   :  { %s2363_s8 = smul.f32 0.001953125, %s2598_s7 }
 0x2b3   :  { %s2600_s9 = spop %2599 }
 0x2b4   :  { %s2365_s3 = smul.f32 %s2363_s8, %s2363_s8 }
 0x2b5   :  { %s2364_s4 = smul.f32 0.001953125, %s2600_s9 }
 0x2b7   :  { %s2366_s10 = ssub.f32 %s2364_s4, %s2365_s3 }
 0x2b9   :  { %s2368_s11 = sadd.f32 1e-05, %s2366_s10 }
 0x2bb   :  { %v2369_v19 = vstv %s2368_s11 }
 0x2bc   :  { %2625 = vrsqrt.f32 %v2369_v19 }
 0x2c9   :  { %v2626_v16 = vpop.eup %2625 }
 0x2ca   :  { %2601 = vpush %v2626_v16 }
 0x2fb   :  { %s2602_s14 = spop %2601 }
 0x2fc   :  { %s2372_s25 = smul.f32 %s2602_s14, %s2583_s12 }
 0x2fe   :  { %s2374_s0 = smul.f32 %s2372_s25, %s2363_s8  ;;  %v2376_v35 = vstv %s2372_s25 }
 0x2ff   :  { %v2377_v29 = vmul.f32 %v2376_v35, %v3748_v23  ;;  %v2378_v28 = vmul.f32 %v2376_v35, %v3750_v6 }
 0x300   :  { %s2375_s15 = ssub.f32 %s2584_s13, %s2374_s0 }
 0x302   :  { %v2379_v36 = vstv %s2375_s15 }
 0x303   :  { %v2380_v40 = vadd.f32 %v2379_v36, %v2377_v29  ;;  %v2381_v1 = vadd.f32 %v2379_v36, %v2378_v28 }
 0x305   :  { %v2382_v58 = vmax.f32 %v2380_v40, 0.0  ;;  %v2383_v60 = vmax.f32 %v2381_v1, 0.0 }
 0x307   :  { %v2386_v49 = vcombine.low %v2382_v58, %v2383_v60 }
 0x309   :  { %v2393_v54 = vrot.slane %v2386_v49, %v2760_v8 }
 0x30b   :  { %v2394_v63 = vcombine.high %v2393_v54, %v2393_v54  ;;  %v2401_v48 = vrot.slane %v2393_v54, %v2760_v8 }
 0x30d   :  { %v2408_v21 = vrot.slane %v2394_v63, %v2760_v8  ;;  %2585 = vst.msk [vmem:[%s3947_s5 + $0x1] ss:$4 sm:$0x3] %vm3861_vm13, %v2401_v48 }
 0x30f   :  { %2586 = vst.msk [vmem:[%s3947_s5 + $0x9] ss:$4 sm:$0x3] %vm3861_vm13, %v2408_v21 }
 0x311   :  { %v2419_v23 = vpop.xlane.xlu0 %2418 }
 0x312   :  { %v2420_v6 = vrot.slane %v2419_v23, 4 }
 0x313   :  { %v2433_v30 = vpop.xlane.xlu1 %2432 }
 0x314   :  { %v2421_v22 = vadd.f32 %v2420_v6, %v2419_v23  ;;  %v2434_v42 = vrot.slane %v2433_v30, 4 }
 0x316   :  { %v2422_v3 = vrot.slane %v2421_v22, 2  ;;  %v2435_v13 = vadd.f32 %v2434_v42, %v2433_v30 }
 0x318   :  { %v2423_v56 = vadd.f32 %v2422_v3, %v2421_v22  ;;  %v2436_v61 = vrot.slane %v2435_v13, 2 }
 0x31a   :  { %v2437_v14 = vadd.f32 %v2436_v61, %v2435_v13  ;;  %v2424_v44 = vrot.slane %v2423_v56, 1 }
 0x31c   :  { %v2425_v45 = vadd.f32 %v2424_v44, %v2423_v56  ;;  %v2438_v47 = vrot.slane %v2437_v14, 1 }
 0x31e   :  { %2603 = vpush %v2425_v45  ;;  %v2439_v41 = vadd.f32 %v2438_v47, %v2437_v14 }
 0x320   :  { %2605 = vpush %v2439_v41 }
 0x34f   :  { %s2604_s21 = spop %2603 }
 0x350   :  { %s2441_s22 = smul.f32 0.001953125, %s2604_s21 }
 0x351   :  { %s2606_s23 = spop %2605 }
 0x352   :  { %s2443_s24 = smul.f32 %s2441_s22, %s2441_s22 }
 0x353   :  { %s2442_s26 = smul.f32 0.001953125, %s2606_s23 }
 0x355   :  { %s2444_s2 = ssub.f32 %s2442_s26, %s2443_s24 }
 0x357   :  { %s2446_s16 = sadd.f32 1e-05, %s2444_s2 }
 0x359   :  { %v2447_v57 = vstv %s2446_s16 }
 0x35a   :  { %2627 = vrsqrt.f32 %v2447_v57 }
 0x367   :  { %v2628_v15 = vpop.eup %2627 }
 0x368   :  { %2607 = vpush %v2628_v15 }
 0x399   :  { %s2608_s28 = spop %2607 }
 0x39a   :  { %s2450_s29 = smul.f32 %s2608_s28, %s2587_s1 }
 0x39c   :  { %s2452_s30 = smul.f32 %s2450_s29, %s2441_s22  ;;  %v2454_v46 = vstv %s2450_s29 }
 0x39d   :  { %v2455_v2 = vmul.f32 %v2454_v46, %v3898_v26  ;;  %v2456_v25 = vmul.f32 %v2454_v46, %v3900_v18 }
 0x39e   :  { %s2453_s6 = ssub.f32 %s2588_s27, %s2452_s30 }
 0x3a0   :  { %v2457_v24 = vstv %s2453_s6 }
 0x3a1   :  { %v2458_v27 = vadd.f32 %v2457_v24, %v2455_v2  ;;  %v2459_v31 = vadd.f32 %v2457_v24, %v2456_v25 }
 0x3a3   :  { %v2460_v51 = vmax.f32 %v2458_v27, 0.0  ;;  %v2461_v9 = vmax.f32 %v2459_v31, 0.0 }
 0x3a5   :  { %v2464_v4 = vcombine.low %v2460_v51, %v2461_v9 }
 0x3a7   :  { %v2471_v38 = vrot.slane %v2464_v4, %v2760_v8 }
 0x3a9   :  { %v2472_v52 = vcombine.high %v2471_v38, %v2471_v38  ;;  %v2479_v5 = vrot.slane %v2471_v38, %v2760_v8 }
 0x3ab   :  { %v2486_v43 = vrot.slane %v2472_v52, %v2760_v8  ;;  %2589 = vst.msk [vmem:[%s3947_s5 + $0x2] ss:$4 sm:$0x3] %vm3861_vm13, %v2479_v5 }
 0x3ad   :  { %2590 = vst.msk [vmem:[%s3947_s5 + $0xa] ss:$4 sm:$0x3] %vm3861_vm13, %v2486_v43 }
 0x3ae   :  { %2497 = vsyncpa [#allocation4], 1 }
 0x3af   :  { %2498 = vsyncpa [#allocation6], 1 }
 0x3b0   :  { %2499 = vsyncpa [#allocation9], 1 }

</bundles_post_ra>
